<compile_context>
chip_gen: v6e
topology: v6e:2x2x1
jax: 0.10.0
libtpu: 0.0.40
codegen_flags: <defaults>
</compile_context>

<pallas_src>
import functools

import jax
import jax.numpy as jnp
from jax.experimental import pallas as pl
from jax.experimental.pallas import tpu as pltpu

EPS = 1e-5
LANE = 128
# Cap chosen to leave headroom on v7x (64 MiB physical) while still letting
# v5e/v6e (128 MiB) use large resident tiles.
VMEM_LIMIT_BYTES = 48 * 1024 * 1024


def _round_up(x, m):
    return ((x + m - 1) // m) * m


def _isz(a):
    return int(a.size) * a.dtype.itemsize


def _compiler_params():
    return pltpu.CompilerParams(
        dimension_semantics=("parallel",),   # image axis is independent
        vmem_limit_bytes=VMEM_LIMIT_BYTES,
    )


# ---------------------------------------------------------------------------
# Pallas kernels
# ---------------------------------------------------------------------------
def _conv3x3_stats_kernel(x_ref, w_ref, y_ref, s_ref, q_ref, *, ho, wo, stride):
    """Implicit-im2col 3x3 conv (pad=1 via pre-padded/phase-split input), one image.

    x_ref : (P*hin, win, cin)  spatially pre-padded input; P = stride**2 polyphase
            slabs stacked along H so every tap below is a contiguous window slice.
    w_ref : (9, cin, cp)       tap-major (kh*3+kw) weight slab, cp lane-dense.
    y_ref : (ho*wo, cp)        pre-BN conv output.
    s_ref/q_ref : (1, cp)      per-image channel sum / sum-of-squares (for BN).
    """
    cin = x_ref.shape[-1]
    cp = w_ref.shape[-1]
    hin = x_ref.shape[0] // (stride * stride)
    acc = jnp.zeros((ho * wo, cp), jnp.float32)
    for kh in range(3):
        for kw in range(3):
            ph = (kh % stride) * stride + (kw % stride)     # polyphase slab index
            r0 = ph * hin + kh // stride
            c0 = kw // stride
            # Contiguous window; reshape is layout-trivial when wo % 8 == 0.
            lhs = x_ref[r0:r0 + ho, c0:c0 + wo, :].reshape(ho * wo, cin)
            acc = acc + jnp.dot(lhs, w_ref[kh * 3 + kw],
                                preferred_element_type=jnp.float32)
    y_ref[...] = acc.astype(y_ref.dtype)
    s_ref[...] = jnp.sum(acc, axis=0, keepdims=True)
    q_ref[...] = jnp.sum(acc * acc, axis=0, keepdims=True)


def _bnrelu_conv3x3_stats_kernel(x_ref, a_ref, c_ref, w_ref, y_ref, s_ref, q_ref,
                                 zbuf_ref, *, ho, wo):
    """BN1+ReLU1 fused on the input slab, then implicit-im2col 3x3 conv (stride 1).

    x_ref : (ho, wo, cp)   pre-BN conv1 output for one image.
    a_ref/c_ref : (1, cp)  folded BN1 scale / shift (f32, global batch stats).
    zbuf_ref : VMEM scratch (ho+2, wo+2, cp): BN+ReLU result written into the
               interior, border left at 0 == the conv's spatial zero padding
               applied AFTER BN+ReLU (this was the old version's bug).
    """
    cp = w_ref.shape[-1]
    z = jnp.maximum(x_ref[...].astype(jnp.float32) * a_ref[...] + c_ref[...], 0.0)
    zbuf_ref[...] = jnp.zeros_like(zbuf_ref)
    zbuf_ref[1:ho + 1, 1:wo + 1, :] = z.astype(zbuf_ref.dtype)
    acc = jnp.zeros((ho * wo, cp), jnp.float32)
    for kh in range(3):
        for kw in range(3):
            lhs = zbuf_ref[kh:kh + ho, kw:kw + wo, :].reshape(ho * wo, cp)
            acc = acc + jnp.dot(lhs, w_ref[kh * 3 + kw],
                                preferred_element_type=jnp.float32)
    y_ref[...] = acc.astype(y_ref.dtype)
    s_ref[...] = jnp.sum(acc, axis=0, keepdims=True)
    q_ref[...] = jnp.sum(acc * acc, axis=0, keepdims=True)


def _bnrelu_add_id_kernel(y_ref, a_ref, c_ref, sx_ref, o_ref):
    """o = relu(y*a + c) + sx   -- identity shortcut (plain VPU add)."""
    out = jnp.maximum(y_ref[...].astype(jnp.float32) * a_ref[...] + c_ref[...], 0.0)
    o_ref[...] = (out + sx_ref[...].astype(jnp.float32)).astype(o_ref.dtype)


def _bnrelu_add_proj_kernel(y_ref, a_ref, c_ref, sx_ref, sw_ref, o_ref):
    """o = relu(y*a + c) + sx @ sw  -- projection (1x1 conv) shortcut fused in."""
    out = jnp.maximum(y_ref[...].astype(jnp.float32) * a_ref[...] + c_ref[...], 0.0)
    sc = jnp.dot(sx_ref[...], sw_ref[...], preferred_element_type=jnp.float32)
    o_ref[...] = (out + sc).astype(o_ref.dtype)


# ---------------------------------------------------------------------------
# pallas_call wrappers (grid = (N,), one image per step, "parallel")
# ---------------------------------------------------------------------------
def _conv3x3(x_stack, w_slab, *, ho, wo, stride, out_dtype):
    n = x_stack.shape[0]
    cin = x_stack.shape[-1]
    cp = w_slab.shape[-1]
    kern = functools.partial(_conv3x3_stats_kernel, ho=ho, wo=wo, stride=stride)
    cost = pl.CostEstimate(
        flops=2 * n * ho * wo * 9 * cin * cp, transcendentals=0,
        bytes_accessed=_isz(x_stack) + _isz(w_slab)
        + n * ho * wo * cp * jnp.dtype(out_dtype).itemsize + 2 * n * cp * 4)
    return pl.pallas_call(
        kern,
        grid_spec=pltpu.PrefetchScalarGridSpec(
            num_scalar_prefetch=0,
            grid=(n,),
            in_specs=[
                pl.BlockSpec((None,) + x_stack.shape[1:], lambda i: (i, 0, 0, 0)),
                pl.BlockSpec(w_slab.shape, lambda i: (0, 0, 0)),
            ],
            out_specs=[
                pl.BlockSpec((None, ho * wo, cp), lambda i: (i, 0, 0)),
                pl.BlockSpec((None, 1, cp), lambda i: (i, 0, 0)),
                pl.BlockSpec((None, 1, cp), lambda i: (i, 0, 0)),
            ],
        ),
        out_shape=(
            jax.ShapeDtypeStruct((n, ho * wo, cp), out_dtype),
            jax.ShapeDtypeStruct((n, 1, cp), jnp.float32),
            jax.ShapeDtypeStruct((n, 1, cp), jnp.float32),
        ),
        compiler_params=_compiler_params(),
        cost_estimate=cost,
    )(x_stack, w_slab)


def _bnrelu_conv3x3(y1_img, scale1, shift1, w_slab, *, out_dtype):
    n, ho, wo, cp = y1_img.shape
    kern = functools.partial(_bnrelu_conv3x3_stats_kernel, ho=ho, wo=wo)
    cost = pl.CostEstimate(
        flops=2 * n * ho * wo * 9 * cp * cp + 4 * n * ho * wo * cp,
        transcendentals=0,
        bytes_accessed=_isz(y1_img) + _isz(w_slab) + _isz(scale1) + _isz(shift1)
        + n * ho * wo * cp * jnp.dtype(out_dtype).itemsize + 2 * n * cp * 4)
    return pl.pallas_call(
        kern,
        grid_spec=pltpu.PrefetchScalarGridSpec(
            num_scalar_prefetch=0,
            grid=(n,),
            in_specs=[
                pl.BlockSpec((None, ho, wo, cp), lambda i: (i, 0, 0, 0)),
                pl.BlockSpec((1, cp), lambda i: (0, 0)),
                pl.BlockSpec((1, cp), lambda i: (0, 0)),
                pl.BlockSpec(w_slab.shape, lambda i: (0, 0, 0)),
            ],
            out_specs=[
                pl.BlockSpec((None, ho * wo, cp), lambda i: (i, 0, 0)),
                pl.BlockSpec((None, 1, cp), lambda i: (i, 0, 0)),
                pl.BlockSpec((None, 1, cp), lambda i: (i, 0, 0)),
            ],
            scratch_shapes=[pltpu.VMEM((ho + 2, wo + 2, cp), out_dtype)],
        ),
        out_shape=(
            jax.ShapeDtypeStruct((n, ho * wo, cp), out_dtype),
            jax.ShapeDtypeStruct((n, 1, cp), jnp.float32),
            jax.ShapeDtypeStruct((n, 1, cp), jnp.float32),
        ),
        compiler_params=_compiler_params(),
        cost_estimate=cost,
    )(y1_img, scale1, shift1, w_slab)


def _bnrelu_add(y2, scale, shift, sx, sw):
    n, rows, cp = y2.shape
    in_specs = [
        pl.BlockSpec((None, rows, cp), lambda i: (i, 0, 0)),
        pl.BlockSpec((1, cp), lambda i: (0, 0)),
        pl.BlockSpec((1, cp), lambda i: (0, 0)),
        pl.BlockSpec((None, rows, sx.shape[-1]), lambda i: (i, 0, 0)),
    ]
    args = [y2, scale, shift, sx]
    flops = 5 * n * rows * cp
    bytes_acc = _isz(y2) + _isz(scale) + _isz(shift) + _isz(sx) + n * rows * cp * 4
    if sw is not None:                          # projection (1x1 conv) shortcut
        in_specs.append(pl.BlockSpec(sw.shape, lambda i: (0, 0)))
        args.append(sw)
        kern = _bnrelu_add_proj_kernel
        flops += 2 * n * rows * sw.shape[0] * cp
        bytes_acc += _isz(sw)
    else:                                       # identity shortcut: no matmul
        kern = _bnrelu_add_id_kernel
    return pl.pallas_call(
        kern,
        grid_spec=pltpu.PrefetchScalarGridSpec(
            num_scalar_prefetch=0,
            grid=(n,),
            in_specs=in_specs,
            out_specs=pl.BlockSpec((None, rows, cp), lambda i: (i, 0, 0)),
        ),
        out_shape=jax.ShapeDtypeStruct((n, rows, cp), jnp.float32),
        compiler_params=_compiler_params(),
        cost_estimate=pl.CostEstimate(flops=flops, transcendentals=0,
                                      bytes_accessed=bytes_acc),
    )(*args)


# ---------------------------------------------------------------------------
# Glue: weight repacking, BN affine fold (plain JAX)
# ---------------------------------------------------------------------------
def _conv3x3_w_slab(w_oihw, cin_pad, cout_pad):
    """(Cout,Cin,3,3) -> (9, cin_pad, cout_pad), tap-major (kh*3+kw)."""
    wt = jnp.transpose(w_oihw, (2, 3, 1, 0))            # (3,3,Cin,Cout)
    wt = jnp.pad(wt, ((0, 0), (0, 0),
                      (0, cin_pad - wt.shape[2]), (0, cout_pad - wt.shape[3])))
    return wt.reshape(9, cin_pad, cout_pad)


def _bn_scale_shift(gamma, beta, count, s, q, cp):
    """Fold global batch stats into per-channel scale/shift (padded channels -> 0).
    NOTE: var = E[y^2]-E[y]^2 in f32; fine at these activation scales."""
    mean = s / count
    var = jnp.maximum(q / count - mean * mean, 0.0)
    g = jnp.pad(gamma.astype(jnp.float32), (0, cp - gamma.shape[0]))
    b = jnp.pad(beta.astype(jnp.float32), (0, cp - beta.shape[0]))
    scale = g * jax.lax.rsqrt(var + EPS)
    shift = b - mean * scale
    return scale, shift


# ---------------------------------------------------------------------------
# Forward
# ---------------------------------------------------------------------------
@functools.partial(jax.jit, static_argnames=("stride", "compute_dtype"))
def preact_block_forward(x_nchw, params, stride, compute_dtype=jnp.bfloat16):
    """PreActBlock forward.  x is NCHW (PyTorch convention); NHWC internally.
    compute_dtype is the MXU operand dtype (bf16 fast path, f32 precise path)."""
    w1, g1, b1, w2, g2, b2, ws = params
    cout, cin = w1.shape[0], w1.shape[1]
    n, _, h, w = x_nchw.shape
    cp = _round_up(cout, LANE)                           # lane-dense output channels

    x = jnp.transpose(x_nchw, (0, 2, 3, 1)).astype(jnp.float32)     # NCHW -> NHWC

    ho = (h - 1) // stride + 1
    wo = (w - 1) // stride + 1
    hoff = 2 // stride                                   # tap offset range per phase
    hin, win = ho + hoff, wo + hoff

    # Spatial zero-pad (conv padding=1) and, for stride 2, 2x2 polyphase split so
    # every in-kernel tap is a contiguous window.  Phases stacked along H.
    xp = jnp.pad(x, ((0, 0), (1, stride * hin - h - 1),
                     (1, stride * win - w - 1), (0, 0)))
    slabs = [xp[:, ph::stride, pw::stride, :][:, :hin, :win, :]
             for ph in range(stride) for pw in range(stride)]
    x_stack = (jnp.concatenate(slabs, axis=1) if stride > 1
               else slabs[0]).astype(compute_dtype)

    # ---- conv1 (implicit im2col) + per-image BN1 statistics ----
    w1_slab = _conv3x3_w_slab(w1, cin, cp).astype(compute_dtype)
    y1, s1, q1 = _conv3x3(x_stack, w1_slab, ho=ho, wo=wo, stride=stride,
                          out_dtype=compute_dtype)
    scale1, shift1 = _bn_scale_shift(
        g1, b1, n * ho * wo, jnp.sum(s1, axis=0)[0], jnp.sum(q1, axis=0)[0], cp)

    # ---- conv2: BN1+ReLU1 fused on the slab (zero border re-applied post-BN),
    #      implicit im2col, per-image BN2 statistics ----
    w2_slab = _conv3x3_w_slab(w2, cp, cp).astype(compute_dtype)
    y2, s2, q2 = _bnrelu_conv3x3(y1.reshape(n, ho, wo, cp),
                                 scale1.reshape(1, cp), shift1.reshape(1, cp),
                                 w2_slab, out_dtype=compute_dtype)
    scale2, shift2 = _bn_scale_shift(
        g2, b2, n * ho * wo, jnp.sum(s2, axis=0)[0], jnp.sum(q2, axis=0)[0], cp)

    # ---- BN2+ReLU2 + shortcut (projection 1x1 conv or identity add) ----
    x_sub = x[:, ::stride, ::stride, :]                  # (n, ho, wo, cin)
    if stride != 1 or cin != cout:
        sx = x_sub.reshape(n, ho * wo, cin).astype(compute_dtype)
        sw = jnp.pad(jnp.transpose(ws, (2, 3, 1, 0)).reshape(cin, cout),
                     ((0, 0), (0, cp - cout))).astype(compute_dtype)
    else:
        sx = jnp.pad(x_sub, ((0, 0), (0, 0), (0, 0),
                             (0, cp - cin))).reshape(n, ho * wo, cp)
        sw = None
    out = _bnrelu_add(y2, scale2.reshape(1, cp), shift2.reshape(1, cp), sx, sw)

    out = out[:, :, :cout].reshape(n, ho, wo, cout)
    return jnp.transpose(out, (0, 3, 1, 2))              # back to NCHW


# ---------------------------------------------------------------------------
# Pure-JAX reference (training-mode BatchNorm, like the PyTorch module default)
# ---------------------------------------------------------------------------
def _reference(x_nchw, params, stride):
    w1, g1, b1, w2, g2, b2, ws = params
    dn = ("NCHW", "OIHW", "NCHW")
    prec = jax.lax.Precision.HIGHEST

    def bn_relu(y, g, b):
        mean = jnp.mean(y, axis=(0, 2, 3), keepdims=True)
        var = jnp.mean((y - mean) ** 2, axis=(0, 2, 3), keepdims=True)
        yn = (y - mean) * jax.lax.rsqrt(var + EPS)
        return jnp.maximum(yn * g[None, :, None, None] + b[None, :, None, None], 0.0)

    out = jax.lax.conv_general_dilated(x_nchw, w1, (stride, stride), [(1, 1), (1, 1)],
                                       dimension_numbers=dn, precision=prec)
    out = bn_relu(out, g1, b1)
    out = jax.lax.conv_general_dilated(out, w2, (1, 1), [(1, 1), (1, 1)],
                                       dimension_numbers=dn, precision=prec)
    out = bn_relu(out, g2, b2)
    if stride != 1 or x_nchw.shape[1] != w1.shape[0]:
        sc = jax.lax.conv_general_dilated(x_nchw, ws, (stride, stride),
                                          [(0, 0), (0, 0)],
                                          dimension_numbers=dn, precision=prec)
    else:
        sc = x_nchw
    return out + sc


# ---------------------------------------------------------------------------
if __name__ == "__main__":
    def make_inputs(key, n, cin, cout, hw, with_proj):
        ks = jax.random.split(key, 8)
        x = jax.random.normal(ks[0], (n, cin, hw, hw), jnp.float32)   # NCHW
        w1 = jax.random.normal(ks[1], (cout, cin, 3, 3), jnp.float32) * 0.1
        w2 = jax.random.normal(ks[2], (cout, cout, 3, 3), jnp.float32) * 0.1
        ws = (jax.random.normal(ks[3], (cout, cin, 1, 1), jnp.float32) * 0.1
              if with_proj else None)
        g1 = 1.0 + 0.1 * jax.random.normal(ks[4], (cout,), jnp.float32)
        b1 = 0.1 * jax.random.normal(ks[5], (cout,), jnp.float32)
        g2 = 1.0 + 0.1 * jax.random.normal(ks[6], (cout,), jnp.float32)
        b2 = 0.1 * jax.random.normal(ks[7], (cout,), jnp.float32)
        return x, (w1, g1, b1, w2, g2, b2, ws)

    k_a, k_b = jax.random.split(jax.random.PRNGKey(0))

    # Config A: projection shortcut (PreActBlock(4, 8, stride=2)), x (2,4,16,16).
    x, params = make_inputs(k_a, 2, 4, 8, 16, with_proj=True)
    ref = _reference(x, params, 2)

    # f32 path.  Tolerance accounts for the backend possibly running f32 matmuls
    # at reduced (bf16-pass) precision at DEFAULT precision; algorithmic errors
    # (e.g. the previous version's padding bug, ~0.22) are far above this.
    out_f32 = jax.block_until_ready(
        preact_block_forward(x, params, 2, compute_dtype=jnp.float32))
    assert out_f32.shape == ref.shape == (2, 8, 8, 8)
    assert jnp.allclose(out_f32, ref, atol=3e-2, rtol=3e-2), \
        float(jnp.max(jnp.abs(out_f32 - ref)))

    # bf16 MXU fast path (loose tolerance: bf16 rounding through two convs,
    # two batch-norm normalizations and the projection matmul).
    out_bf16 = jax.block_until_ready(preact_block_forward(x, params, 2))
    assert jnp.allclose(out_bf16, ref, atol=2.5e-1, rtol=1e-1), \
        float(jnp.max(jnp.abs(out_bf16 - ref)))

    # Config B: identity shortcut (PreActBlock(8, 8, stride=1)), x (2,8,8,8).
    x_b, params_b = make_inputs(k_b, 2, 8, 8, 8, with_proj=False)
    ref_b = _reference(x_b, params_b, 1)
    out_b = jax.block_until_ready(
        preact_block_forward(x_b, params_b, 1, compute_dtype=jnp.float32))
    assert out_b.shape == ref_b.shape == (2, 8, 8, 8)
    assert jnp.allclose(out_b, ref_b, atol=3e-2, rtol=3e-2), \
        float(jnp.max(jnp.abs(out_b - ref_b)))

    print("KERNEL_OK")
</pallas_src>

<mosaic_0001>
module attributes {stable_mosaic.version = 11 : i64} {
  func.func @_conv3x3_stats_kernel(%arg0: i32, %arg1: memref<1x36x9x4xf32, #tpu.memory_space<vmem>>, %arg2: memref<9x4x128xf32, #tpu.memory_space<vmem>>, %arg3: memref<1x64x128xf32, #tpu.memory_space<vmem>>, %arg4: memref<1x1x128xf32, #tpu.memory_space<vmem>>, %arg5: memref<1x1x128xf32, #tpu.memory_space<vmem>>) attributes {dimension_semantics = [#tpu.dimension_semantics<parallel>], iteration_bounds = array<i64: 2>, scalar_prefetch = 0 : i64, scratch_operands = 0 : i64, tpu.core_type = #tpu.core_type<tc>, window_params = [{transform_indices = @transform_0, window_bounds = array<i64: 1, 36, 9, 4>}, {pipeline_mode = #tpu.pipeline_mode<synchronous>, transform_indices = @transform_1, window_bounds = array<i64: 9, 4, 128>}, {transform_indices = @transform_2, window_bounds = array<i64: 1, 64, 128>}, {transform_indices = @transform_3, window_bounds = array<i64: 1, 1, 128>}, {transform_indices = @transform_4, window_bounds = array<i64: 1, 1, 128>}]} {
    %cst = arith.constant 0.000000e+00 : f32
    %0 = vector.broadcast %cst : f32 to vector<64x128xf32>
    %c0 = arith.constant 0 : index
    %c0_0 = arith.constant 0 : index
    %c0_1 = arith.constant 0 : index
    %c0_2 = arith.constant 0 : index
    %1 = vector.load %arg1[%c0, %c0_0, %c0_1, %c0_2] : memref<1x36x9x4xf32, #tpu.memory_space<vmem>>, vector<1x8x8x4xf32>
    %2 = vector.shape_cast %1 : vector<1x8x8x4xf32> to vector<8x8x4xf32>
    %3 = vector.shape_cast %2 : vector<8x8x4xf32> to vector<64x4xf32>
    %c0_3 = arith.constant 0 : index
    %c0_4 = arith.constant 0 : index
    %c0_5 = arith.constant 0 : index
    %4 = vector.load %arg2[%c0_3, %c0_4, %c0_5] : memref<9x4x128xf32, #tpu.memory_space<vmem>>, vector<1x4x128xf32>
    %5 = vector.shape_cast %4 : vector<1x4x128xf32> to vector<4x128xf32>
    %cst_6 = arith.constant dense<0.000000e+00> : vector<64x128xf32>
    %6 = tpu.matmul %3, %5, %cst_6 {dimension_numbers = #tpu.dot_dimension_numbers<[1], [0], [0], [1], [0, 0, 1, 1], [], []>} : vector<64x4xf32>, vector<4x128xf32>, vector<64x128xf32> -> vector<64x128xf32>
    %7 = arith.addf %0, %6 : vector<64x128xf32>
    %c0_7 = arith.constant 0 : index
    %c9 = arith.constant 9 : index
    %c0_8 = arith.constant 0 : index
    %c0_9 = arith.constant 0 : index
    %8 = vector.load %arg1[%c0_7, %c9, %c0_8, %c0_9] : memref<1x36x9x4xf32, #tpu.memory_space<vmem>>, vector<1x8x8x4xf32>
    %9 = vector.shape_cast %8 : vector<1x8x8x4xf32> to vector<8x8x4xf32>
    %10 = vector.shape_cast %9 : vector<8x8x4xf32> to vector<64x4xf32>
    %c1 = arith.constant 1 : index
    %c0_10 = arith.constant 0 : index
    %c0_11 = arith.constant 0 : index
    %11 = vector.load %arg2[%c1, %c0_10, %c0_11] : memref<9x4x128xf32, #tpu.memory_space<vmem>>, vector<1x4x128xf32>
    %12 = vector.shape_cast %11 : vector<1x4x128xf32> to vector<4x128xf32>
    %cst_12 = arith.constant dense<0.000000e+00> : vector<64x128xf32>
    %13 = tpu.matmul %10, %12, %cst_12 {dimension_numbers = #tpu.dot_dimension_numbers<[1], [0], [0], [1], [0, 0, 1, 1], [], []>} : vector<64x4xf32>, vector<4x128xf32>, vector<64x128xf32> -> vector<64x128xf32>
    %14 = arith.addf %7, %13 : vector<64x128xf32>
    %c0_13 = arith.constant 0 : index
    %c0_14 = arith.constant 0 : index
    %c1_15 = arith.constant 1 : index
    %c0_16 = arith.constant 0 : index
    %15 = vector.load %arg1[%c0_13, %c0_14, %c1_15, %c0_16] : memref<1x36x9x4xf32, #tpu.memory_space<vmem>>, vector<1x8x8x4xf32>
    %16 = vector.shape_cast %15 : vector<1x8x8x4xf32> to vector<8x8x4xf32>
    %17 = vector.shape_cast %16 : vector<8x8x4xf32> to vector<64x4xf32>
    %c2 = arith.constant 2 : index
    %c0_17 = arith.constant 0 : index
    %c0_18 = arith.constant 0 : index
    %18 = vector.load %arg2[%c2, %c0_17, %c0_18] : memref<9x4x128xf32, #tpu.memory_space<vmem>>, vector<1x4x128xf32>
    %19 = vector.shape_cast %18 : vector<1x4x128xf32> to vector<4x128xf32>
    %cst_19 = arith.constant dense<0.000000e+00> : vector<64x128xf32>
    %20 = tpu.matmul %17, %19, %cst_19 {dimension_numbers = #tpu.dot_dimension_numbers<[1], [0], [0], [1], [0, 0, 1, 1], [], []>} : vector<64x4xf32>, vector<4x128xf32>, vector<64x128xf32> -> vector<64x128xf32>
    %21 = arith.addf %14, %20 : vector<64x128xf32>
    %c0_20 = arith.constant 0 : index
    %c18 = arith.constant 18 : index
    %c0_21 = arith.constant 0 : index
    %c0_22 = arith.constant 0 : index
    %22 = vector.load %arg1[%c0_20, %c18, %c0_21, %c0_22] : memref<1x36x9x4xf32, #tpu.memory_space<vmem>>, vector<1x8x8x4xf32>
    %23 = vector.shape_cast %22 : vector<1x8x8x4xf32> to vector<8x8x4xf32>
    %24 = vector.shape_cast %23 : vector<8x8x4xf32> to vector<64x4xf32>
    %c3 = arith.constant 3 : index
    %c0_23 = arith.constant 0 : index
    %c0_24 = arith.constant 0 : index
    %25 = vector.load %arg2[%c3, %c0_23, %c0_24] : memref<9x4x128xf32, #tpu.memory_space<vmem>>, vector<1x4x128xf32>
    %26 = vector.shape_cast %25 : vector<1x4x128xf32> to vector<4x128xf32>
    %cst_25 = arith.constant dense<0.000000e+00> : vector<64x128xf32>
    %27 = tpu.matmul %24, %26, %cst_25 {dimension_numbers = #tpu.dot_dimension_numbers<[1], [0], [0], [1], [0, 0, 1, 1], [], []>} : vector<64x4xf32>, vector<4x128xf32>, vector<64x128xf32> -> vector<64x128xf32>
    %28 = arith.addf %21, %27 : vector<64x128xf32>
    %c0_26 = arith.constant 0 : index
    %c27 = arith.constant 27 : index
    %c0_27 = arith.constant 0 : index
    %c0_28 = arith.constant 0 : index
    %29 = vector.load %arg1[%c0_26, %c27, %c0_27, %c0_28] : memref<1x36x9x4xf32, #tpu.memory_space<vmem>>, vector<1x8x8x4xf32>
    %30 = vector.shape_cast %29 : vector<1x8x8x4xf32> to vector<8x8x4xf32>
    %31 = vector.shape_cast %30 : vector<8x8x4xf32> to vector<64x4xf32>
    %c4 = arith.constant 4 : index
    %c0_29 = arith.constant 0 : index
    %c0_30 = arith.constant 0 : index
    %32 = vector.load %arg2[%c4, %c0_29, %c0_30] : memref<9x4x128xf32, #tpu.memory_space<vmem>>, vector<1x4x128xf32>
    %33 = vector.shape_cast %32 : vector<1x4x128xf32> to vector<4x128xf32>
    %cst_31 = arith.constant dense<0.000000e+00> : vector<64x128xf32>
    %34 = tpu.matmul %31, %33, %cst_31 {dimension_numbers = #tpu.dot_dimension_numbers<[1], [0], [0], [1], [0, 0, 1, 1], [], []>} : vector<64x4xf32>, vector<4x128xf32>, vector<64x128xf32> -> vector<64x128xf32>
    %35 = arith.addf %28, %34 : vector<64x128xf32>
    %c0_32 = arith.constant 0 : index
    %c18_33 = arith.constant 18 : index
    %c1_34 = arith.constant 1 : index
    %c0_35 = arith.constant 0 : index
    %36 = vector.load %arg1[%c0_32, %c18_33, %c1_34, %c0_35] : memref<1x36x9x4xf32, #tpu.memory_space<vmem>>, vector<1x8x8x4xf32>
    %37 = vector.shape_cast %36 : vector<1x8x8x4xf32> to vector<8x8x4xf32>
    %38 = vector.shape_cast %37 : vector<8x8x4xf32> to vector<64x4xf32>
    %c5 = arith.constant 5 : index
    %c0_36 = arith.constant 0 : index
    %c0_37 = arith.constant 0 : index
    %39 = vector.load %arg2[%c5, %c0_36, %c0_37] : memref<9x4x128xf32, #tpu.memory_space<vmem>>, vector<1x4x128xf32>
    %40 = vector.shape_cast %39 : vector<1x4x128xf32> to vector<4x128xf32>
    %cst_38 = arith.constant dense<0.000000e+00> : vector<64x128xf32>
    %41 = tpu.matmul %38, %40, %cst_38 {dimension_numbers = #tpu.dot_dimension_numbers<[1], [0], [0], [1], [0, 0, 1, 1], [], []>} : vector<64x4xf32>, vector<4x128xf32>, vector<64x128xf32> -> vector<64x128xf32>
    %42 = arith.addf %35, %41 : vector<64x128xf32>
    %c0_39 = arith.constant 0 : index
    %c1_40 = arith.constant 1 : index
    %c0_41 = arith.constant 0 : index
    %c0_42 = arith.constant 0 : index
    %43 = vector.load %arg1[%c0_39, %c1_40, %c0_41, %c0_42] : memref<1x36x9x4xf32, #tpu.memory_space<vmem>>, vector<1x8x8x4xf32>
    %44 = vector.shape_cast %43 : vector<1x8x8x4xf32> to vector<8x8x4xf32>
    %45 = vector.shape_cast %44 : vector<8x8x4xf32> to vector<64x4xf32>
    %c6 = arith.constant 6 : index
    %c0_43 = arith.constant 0 : index
    %c0_44 = arith.constant 0 : index
    %46 = vector.load %arg2[%c6, %c0_43, %c0_44] : memref<9x4x128xf32, #tpu.memory_space<vmem>>, vector<1x4x128xf32>
    %47 = vector.shape_cast %46 : vector<1x4x128xf32> to vector<4x128xf32>
    %cst_45 = arith.constant dense<0.000000e+00> : vector<64x128xf32>
    %48 = tpu.matmul %45, %47, %cst_45 {dimension_numbers = #tpu.dot_dimension_numbers<[1], [0], [0], [1], [0, 0, 1, 1], [], []>} : vector<64x4xf32>, vector<4x128xf32>, vector<64x128xf32> -> vector<64x128xf32>
    %49 = arith.addf %42, %48 : vector<64x128xf32>
    %c0_46 = arith.constant 0 : index
    %c10 = arith.constant 10 : index
    %c0_47 = arith.constant 0 : index
    %c0_48 = arith.constant 0 : index
    %50 = vector.load %arg1[%c0_46, %c10, %c0_47, %c0_48] : memref<1x36x9x4xf32, #tpu.memory_space<vmem>>, vector<1x8x8x4xf32>
    %51 = vector.shape_cast %50 : vector<1x8x8x4xf32> to vector<8x8x4xf32>
    %52 = vector.shape_cast %51 : vector<8x8x4xf32> to vector<64x4xf32>
    %c7 = arith.constant 7 : index
    %c0_49 = arith.constant 0 : index
    %c0_50 = arith.constant 0 : index
    %53 = vector.load %arg2[%c7, %c0_49, %c0_50] : memref<9x4x128xf32, #tpu.memory_space<vmem>>, vector<1x4x128xf32>
    %54 = vector.shape_cast %53 : vector<1x4x128xf32> to vector<4x128xf32>
    %cst_51 = arith.constant dense<0.000000e+00> : vector<64x128xf32>
    %55 = tpu.matmul %52, %54, %cst_51 {dimension_numbers = #tpu.dot_dimension_numbers<[1], [0], [0], [1], [0, 0, 1, 1], [], []>} : vector<64x4xf32>, vector<4x128xf32>, vector<64x128xf32> -> vector<64x128xf32>
    %56 = arith.addf %49, %55 : vector<64x128xf32>
    %c0_52 = arith.constant 0 : index
    %c1_53 = arith.constant 1 : index
    %c1_54 = arith.constant 1 : index
    %c0_55 = arith.constant 0 : index
    %57 = vector.load %arg1[%c0_52, %c1_53, %c1_54, %c0_55] : memref<1x36x9x4xf32, #tpu.memory_space<vmem>>, vector<1x8x8x4xf32>
    %58 = vector.shape_cast %57 : vector<1x8x8x4xf32> to vector<8x8x4xf32>
    %59 = vector.shape_cast %58 : vector<8x8x4xf32> to vector<64x4xf32>
    %c8 = arith.constant 8 : index
    %c0_56 = arith.constant 0 : index
    %c0_57 = arith.constant 0 : index
    %60 = vector.load %arg2[%c8, %c0_56, %c0_57] : memref<9x4x128xf32, #tpu.memory_space<vmem>>, vector<1x4x128xf32>
    %61 = vector.shape_cast %60 : vector<1x4x128xf32> to vector<4x128xf32>
    %cst_58 = arith.constant dense<0.000000e+00> : vector<64x128xf32>
    %62 = tpu.matmul %59, %61, %cst_58 {dimension_numbers = #tpu.dot_dimension_numbers<[1], [0], [0], [1], [0, 0, 1, 1], [], []>} : vector<64x4xf32>, vector<4x128xf32>, vector<64x128xf32> -> vector<64x128xf32>
    %63 = arith.addf %56, %62 : vector<64x128xf32>
    %c0_59 = arith.constant 0 : index
    %c0_60 = arith.constant 0 : index
    %c0_61 = arith.constant 0 : index
    %64 = vector.load %arg3[%c0_59, %c0_60, %c0_61] : memref<1x64x128xf32, #tpu.memory_space<vmem>>, vector<1x64x128xf32>
    %65 = vector.shape_cast %64 : vector<1x64x128xf32> to vector<64x128xf32>
    %66 = vector.shape_cast %63 : vector<64x128xf32> to vector<1x64x128xf32>
    tpu.vector_store %arg3[%c0_59, %c0_60, %c0_61], %66 {strides = array<i32>} : memref<1x64x128xf32, #tpu.memory_space<vmem>>, vector<1x64x128xf32>,
    %cst_62 = arith.constant dense<0.000000e+00> : vector<128xf32>
    %67 = vector.multi_reduction <add>, %63, %cst_62 [0] : vector<64x128xf32> to vector<128xf32>
    %68 = vector.shape_cast %67 : vector<128xf32> to vector<1x128xf32>
    %c0_63 = arith.constant 0 : index
    %c0_64 = arith.constant 0 : index
    %c0_65 = arith.constant 0 : index
    %69 = vector.load %arg4[%c0_63, %c0_64, %c0_65] : memref<1x1x128xf32, #tpu.memory_space<vmem>>, vector<1x1x128xf32>
    %70 = vector.shape_cast %69 : vector<1x1x128xf32> to vector<1x128xf32>
    %71 = vector.shape_cast %68 : vector<1x128xf32> to vector<1x1x128xf32>
    tpu.vector_store %arg4[%c0_63, %c0_64, %c0_65], %71 {strides = array<i32>} : memref<1x1x128xf32, #tpu.memory_space<vmem>>, vector<1x1x128xf32>,
    %72 = arith.mulf %63, %63 : vector<64x128xf32>
    %cst_66 = arith.constant dense<0.000000e+00> : vector<128xf32>
    %73 = vector.multi_reduction <add>, %72, %cst_66 [0] : vector<64x128xf32> to vector<128xf32>
    %74 = vector.shape_cast %73 : vector<128xf32> to vector<1x128xf32>
    %c0_67 = arith.constant 0 : index
    %c0_68 = arith.constant 0 : index
    %c0_69 = arith.constant 0 : index
    %75 = vector.load %arg5[%c0_67, %c0_68, %c0_69] : memref<1x1x128xf32, #tpu.memory_space<vmem>>, vector<1x1x128xf32>
    %76 = vector.shape_cast %75 : vector<1x1x128xf32> to vector<1x128xf32>
    %77 = vector.shape_cast %74 : vector<1x128xf32> to vector<1x1x128xf32>
    tpu.vector_store %arg5[%c0_67, %c0_68, %c0_69], %77 {strides = array<i32>} : memref<1x1x128xf32, #tpu.memory_space<vmem>>, vector<1x1x128xf32>,
    return
  }
  func.func @transform_0(%arg0: i32) -> (i32, i32, i32, i32) {
    %c0_i32 = arith.constant 0 : i32
    %c0_i32_0 = arith.constant 0 : i32
    %c0_i32_1 = arith.constant 0 : i32
    %c0_i32_2 = arith.constant 0 : i32
    return %arg0, %c0_i32, %c0_i32_0, %c0_i32_1 : i32, i32, i32, i32
  }
  func.func @transform_1(%arg0: i32) -> (i32, i32, i32) {
    %c0_i32 = arith.constant 0 : i32
    %c0_i32_0 = arith.constant 0 : i32
    %c0_i32_1 = arith.constant 0 : i32
    %c0_i32_2 = arith.constant 0 : i32
    return %c0_i32, %c0_i32_0, %c0_i32_1 : i32, i32, i32
  }
  func.func @transform_2(%arg0: i32) -> (i32, i32, i32) {
    %c0_i32 = arith.constant 0 : i32
    %c0_i32_0 = arith.constant 0 : i32
    %c0_i32_1 = arith.constant 0 : i32
    return %arg0, %c0_i32, %c0_i32_0 : i32, i32, i32
  }
  func.func @transform_3(%arg0: i32) -> (i32, i32, i32) {
    %c0_i32 = arith.constant 0 : i32
    %c0_i32_0 = arith.constant 0 : i32
    %c0_i32_1 = arith.constant 0 : i32
    return %arg0, %c0_i32, %c0_i32_0 : i32, i32, i32
  }
  func.func @transform_4(%arg0: i32) -> (i32, i32, i32) {
    %c0_i32 = arith.constant 0 : i32
    %c0_i32_0 = arith.constant 0 : i32
    %c0_i32_1 = arith.constant 0 : i32
    return %arg0, %c0_i32, %c0_i32_0 : i32, i32, i32
  }
}

module attributes {stable_mosaic.version = 11 : i64} {
  func.func @_bnrelu_conv3x3_stats_kernel(%arg0: i32, %arg1: memref<1x8x8x128xf32, #tpu.memory_space<vmem>>, %arg2: memref<1x128xf32, #tpu.memory_space<vmem>>, %arg3: memref<1x128xf32, #tpu.memory_space<vmem>>, %arg4: memref<9x128x128xf32, #tpu.memory_space<vmem>>, %arg5: memref<1x64x128xf32, #tpu.memory_space<vmem>>, %arg6: memref<1x1x128xf32, #tpu.memory_space<vmem>>, %arg7: memref<1x1x128xf32, #tpu.memory_space<vmem>>, %arg8: memref<10x10x128xf32, #tpu.memory_space<vmem>>) attributes {dimension_semantics = [#tpu.dimension_semantics<parallel>], iteration_bounds = array<i64: 2>, scalar_prefetch = 0 : i64, scratch_operands = 1 : i64, tpu.core_type = #tpu.core_type<tc>, window_params = [{transform_indices = @transform_0, window_bounds = array<i64: 1, 8, 8, 128>}, {pipeline_mode = #tpu.pipeline_mode<synchronous>, transform_indices = @transform_1, window_bounds = array<i64: 1, 128>}, {pipeline_mode = #tpu.pipeline_mode<synchronous>, transform_indices = @transform_2, window_bounds = array<i64: 1, 128>}, {pipeline_mode = #tpu.pipeline_mode<synchronous>, transform_indices = @transform_3, window_bounds = array<i64: 9, 128, 128>}, {transform_indices = @transform_4, window_bounds = array<i64: 1, 64, 128>}, {transform_indices = @transform_5, window_bounds = array<i64: 1, 1, 128>}, {transform_indices = @transform_6, window_bounds = array<i64: 1, 1, 128>}]} {
    %c0 = arith.constant 0 : index
    %c0_0 = arith.constant 0 : index
    %c0_1 = arith.constant 0 : index
    %c0_2 = arith.constant 0 : index
    %0 = vector.load %arg1[%c0, %c0_0, %c0_1, %c0_2] : memref<1x8x8x128xf32, #tpu.memory_space<vmem>>, vector<1x8x8x128xf32>
    %1 = vector.shape_cast %0 : vector<1x8x8x128xf32> to vector<8x8x128xf32>
    %c0_3 = arith.constant 0 : index
    %c0_4 = arith.constant 0 : index
    %2 = vector.load %arg2[%c0_3, %c0_4] : memref<1x128xf32, #tpu.memory_space<vmem>>, vector<1x128xf32>
    %3 = vector.shape_cast %2 : vector<1x128xf32> to vector<1x1x128xf32>
    %4 = vector.broadcast %3 : vector<1x1x128xf32> to vector<8x8x128xf32>
    %5 = arith.mulf %1, %4 : vector<8x8x128xf32>
    %c0_5 = arith.constant 0 : index
    %c0_6 = arith.constant 0 : index
    %6 = vector.load %arg3[%c0_5, %c0_6] : memref<1x128xf32, #tpu.memory_space<vmem>>, vector<1x128xf32>
    %7 = vector.shape_cast %6 : vector<1x128xf32> to vector<1x1x128xf32>
    %8 = vector.broadcast %7 : vector<1x1x128xf32> to vector<8x8x128xf32>
    %9 = arith.addf %5, %8 : vector<8x8x128xf32>
    %cst = arith.constant 0.000000e+00 : f32
    %10 = vector.broadcast %cst : f32 to vector<8x8x128xf32>
    %11 = arith.maximumf %9, %10 : vector<8x8x128xf32>
    %cst_7 = arith.constant 0.000000e+00 : f32
    %12 = vector.broadcast %cst_7 : f32 to vector<10x10x128xf32>
    %c0_8 = arith.constant 0 : index
    %c0_9 = arith.constant 0 : index
    %c0_10 = arith.constant 0 : index
    %13 = vector.load %arg8[%c0_8, %c0_9, %c0_10] : memref<10x10x128xf32, #tpu.memory_space<vmem>>, vector<10x10x128xf32>
    tpu.vector_store %arg8[%c0_8, %c0_9, %c0_10], %12 {strides = array<i32>} : memref<10x10x128xf32, #tpu.memory_space<vmem>>, vector<10x10x128xf32>,
    %c1 = arith.constant 1 : index
    %c1_11 = arith.constant 1 : index
    %c0_12 = arith.constant 0 : index
    %14 = vector.load %arg8[%c1, %c1_11, %c0_12] : memref<10x10x128xf32, #tpu.memory_space<vmem>>, vector<8x8x128xf32>
    tpu.vector_store %arg8[%c1, %c1_11, %c0_12], %11 {strides = array<i32>} : memref<10x10x128xf32, #tpu.memory_space<vmem>>, vector<8x8x128xf32>,
    %cst_13 = arith.constant 0.000000e+00 : f32
    %15 = vector.broadcast %cst_13 : f32 to vector<64x128xf32>
    %c0_14 = arith.constant 0 : index
    %c0_15 = arith.constant 0 : index
    %c0_16 = arith.constant 0 : index
    %16 = vector.load %arg8[%c0_14, %c0_15, %c0_16] : memref<10x10x128xf32, #tpu.memory_space<vmem>>, vector<8x8x128xf32>
    %17 = vector.shape_cast %16 : vector<8x8x128xf32> to vector<64x128xf32>
    %c0_17 = arith.constant 0 : index
    %c0_18 = arith.constant 0 : index
    %c0_19 = arith.constant 0 : index
    %18 = vector.load %arg4[%c0_17, %c0_18, %c0_19] : memref<9x128x128xf32, #tpu.memory_space<vmem>>, vector<1x128x128xf32>
    %19 = vector.shape_cast %18 : vector<1x128x128xf32> to vector<128x128xf32>
    %cst_20 = arith.constant dense<0.000000e+00> : vector<64x128xf32>
    %20 = tpu.matmul %17, %19, %cst_20 {dimension_numbers = #tpu.dot_dimension_numbers<[1], [0], [0], [1], [0, 0, 1, 1], [], []>} : vector<64x128xf32>, vector<128x128xf32>, vector<64x128xf32> -> vector<64x128xf32>
    %21 = arith.addf %15, %20 : vector<64x128xf32>
    %c0_21 = arith.constant 0 : index
    %c1_22 = arith.constant 1 : index
    %c0_23 = arith.constant 0 : index
    %22 = vector.load %arg8[%c0_21, %c1_22, %c0_23] : memref<10x10x128xf32, #tpu.memory_space<vmem>>, vector<8x8x128xf32>
    %23 = vector.shape_cast %22 : vector<8x8x128xf32> to vector<64x128xf32>
    %c1_24 = arith.constant 1 : index
    %c0_25 = arith.constant 0 : index
    %c0_26 = arith.constant 0 : index
    %24 = vector.load %arg4[%c1_24, %c0_25, %c0_26] : memref<9x128x128xf32, #tpu.memory_space<vmem>>, vector<1x128x128xf32>
    %25 = vector.shape_cast %24 : vector<1x128x128xf32> to vector<128x128xf32>
    %cst_27 = arith.constant dense<0.000000e+00> : vector<64x128xf32>
    %26 = tpu.matmul %23, %25, %cst_27 {dimension_numbers = #tpu.dot_dimension_numbers<[1], [0], [0], [1], [0, 0, 1, 1], [], []>} : vector<64x128xf32>, vector<128x128xf32>, vector<64x128xf32> -> vector<64x128xf32>
    %27 = arith.addf %21, %26 : vector<64x128xf32>
    %c0_28 = arith.constant 0 : index
    %c2 = arith.constant 2 : index
    %c0_29 = arith.constant 0 : index
    %28 = vector.load %arg8[%c0_28, %c2, %c0_29] : memref<10x10x128xf32, #tpu.memory_space<vmem>>, vector<8x8x128xf32>
    %29 = vector.shape_cast %28 : vector<8x8x128xf32> to vector<64x128xf32>
    %c2_30 = arith.constant 2 : index
    %c0_31 = arith.constant 0 : index
    %c0_32 = arith.constant 0 : index
    %30 = vector.load %arg4[%c2_30, %c0_31, %c0_32] : memref<9x128x128xf32, #tpu.memory_space<vmem>>, vector<1x128x128xf32>
    %31 = vector.shape_cast %30 : vector<1x128x128xf32> to vector<128x128xf32>
    %cst_33 = arith.constant dense<0.000000e+00> : vector<64x128xf32>
    %32 = tpu.matmul %29, %31, %cst_33 {dimension_numbers = #tpu.dot_dimension_numbers<[1], [0], [0], [1], [0, 0, 1, 1], [], []>} : vector<64x128xf32>, vector<128x128xf32>, vector<64x128xf32> -> vector<64x128xf32>
    %33 = arith.addf %27, %32 : vector<64x128xf32>
    %c1_34 = arith.constant 1 : index
    %c0_35 = arith.constant 0 : index
    %c0_36 = arith.constant 0 : index
    %34 = vector.load %arg8[%c1_34, %c0_35, %c0_36] : memref<10x10x128xf32, #tpu.memory_space<vmem>>, vector<8x8x128xf32>
    %35 = vector.shape_cast %34 : vector<8x8x128xf32> to vector<64x128xf32>
    %c3 = arith.constant 3 : index
    %c0_37 = arith.constant 0 : index
    %c0_38 = arith.constant 0 : index
    %36 = vector.load %arg4[%c3, %c0_37, %c0_38] : memref<9x128x128xf32, #tpu.memory_space<vmem>>, vector<1x128x128xf32>
    %37 = vector.shape_cast %36 : vector<1x128x128xf32> to vector<128x128xf32>
    %cst_39 = arith.constant dense<0.000000e+00> : vector<64x128xf32>
    %38 = tpu.matmul %35, %37, %cst_39 {dimension_numbers = #tpu.dot_dimension_numbers<[1], [0], [0], [1], [0, 0, 1, 1], [], []>} : vector<64x128xf32>, vector<128x128xf32>, vector<64x128xf32> -> vector<64x128xf32>
    %39 = arith.addf %33, %38 : vector<64x128xf32>
    %c1_40 = arith.constant 1 : index
    %c1_41 = arith.constant 1 : index
    %c0_42 = arith.constant 0 : index
    %40 = vector.load %arg8[%c1_40, %c1_41, %c0_42] : memref<10x10x128xf32, #tpu.memory_space<vmem>>, vector<8x8x128xf32>
    %41 = vector.shape_cast %40 : vector<8x8x128xf32> to vector<64x128xf32>
    %c4 = arith.constant 4 : index
    %c0_43 = arith.constant 0 : index
    %c0_44 = arith.constant 0 : index
    %42 = vector.load %arg4[%c4, %c0_43, %c0_44] : memref<9x128x128xf32, #tpu.memory_space<vmem>>, vector<1x128x128xf32>
    %43 = vector.shape_cast %42 : vector<1x128x128xf32> to vector<128x128xf32>
    %cst_45 = arith.constant dense<0.000000e+00> : vector<64x128xf32>
    %44 = tpu.matmul %41, %43, %cst_45 {dimension_numbers = #tpu.dot_dimension_numbers<[1], [0], [0], [1], [0, 0, 1, 1], [], []>} : vector<64x128xf32>, vector<128x128xf32>, vector<64x128xf32> -> vector<64x128xf32>
    %45 = arith.addf %39, %44 : vector<64x128xf32>
    %c1_46 = arith.constant 1 : index
    %c2_47 = arith.constant 2 : index
    %c0_48 = arith.constant 0 : index
    %46 = vector.load %arg8[%c1_46, %c2_47, %c0_48] : memref<10x10x128xf32, #tpu.memory_space<vmem>>, vector<8x8x128xf32>
    %47 = vector.shape_cast %46 : vector<8x8x128xf32> to vector<64x128xf32>
    %c5 = arith.constant 5 : index
    %c0_49 = arith.constant 0 : index
    %c0_50 = arith.constant 0 : index
    %48 = vector.load %arg4[%c5, %c0_49, %c0_50] : memref<9x128x128xf32, #tpu.memory_space<vmem>>, vector<1x128x128xf32>
    %49 = vector.shape_cast %48 : vector<1x128x128xf32> to vector<128x128xf32>
    %cst_51 = arith.constant dense<0.000000e+00> : vector<64x128xf32>
    %50 = tpu.matmul %47, %49, %cst_51 {dimension_numbers = #tpu.dot_dimension_numbers<[1], [0], [0], [1], [0, 0, 1, 1], [], []>} : vector<64x128xf32>, vector<128x128xf32>, vector<64x128xf32> -> vector<64x128xf32>
    %51 = arith.addf %45, %50 : vector<64x128xf32>
    %c2_52 = arith.constant 2 : index
    %c0_53 = arith.constant 0 : index
    %c0_54 = arith.constant 0 : index
    %52 = vector.load %arg8[%c2_52, %c0_53, %c0_54] : memref<10x10x128xf32, #tpu.memory_space<vmem>>, vector<8x8x128xf32>
    %53 = vector.shape_cast %52 : vector<8x8x128xf32> to vector<64x128xf32>
    %c6 = arith.constant 6 : index
    %c0_55 = arith.constant 0 : index
    %c0_56 = arith.constant 0 : index
    %54 = vector.load %arg4[%c6, %c0_55, %c0_56] : memref<9x128x128xf32, #tpu.memory_space<vmem>>, vector<1x128x128xf32>
    %55 = vector.shape_cast %54 : vector<1x128x128xf32> to vector<128x128xf32>
    %cst_57 = arith.constant dense<0.000000e+00> : vector<64x128xf32>
    %56 = tpu.matmul %53, %55, %cst_57 {dimension_numbers = #tpu.dot_dimension_numbers<[1], [0], [0], [1], [0, 0, 1, 1], [], []>} : vector<64x128xf32>, vector<128x128xf32>, vector<64x128xf32> -> vector<64x128xf32>
    %57 = arith.addf %51, %56 : vector<64x128xf32>
    %c2_58 = arith.constant 2 : index
    %c1_59 = arith.constant 1 : index
    %c0_60 = arith.constant 0 : index
    %58 = vector.load %arg8[%c2_58, %c1_59, %c0_60] : memref<10x10x128xf32, #tpu.memory_space<vmem>>, vector<8x8x128xf32>
    %59 = vector.shape_cast %58 : vector<8x8x128xf32> to vector<64x128xf32>
    %c7 = arith.constant 7 : index
    %c0_61 = arith.constant 0 : index
    %c0_62 = arith.constant 0 : index
    %60 = vector.load %arg4[%c7, %c0_61, %c0_62] : memref<9x128x128xf32, #tpu.memory_space<vmem>>, vector<1x128x128xf32>
    %61 = vector.shape_cast %60 : vector<1x128x128xf32> to vector<128x128xf32>
    %cst_63 = arith.constant dense<0.000000e+00> : vector<64x128xf32>
    %62 = tpu.matmul %59, %61, %cst_63 {dimension_numbers = #tpu.dot_dimension_numbers<[1], [0], [0], [1], [0, 0, 1, 1], [], []>} : vector<64x128xf32>, vector<128x128xf32>, vector<64x128xf32> -> vector<64x128xf32>
    %63 = arith.addf %57, %62 : vector<64x128xf32>
    %c2_64 = arith.constant 2 : index
    %c2_65 = arith.constant 2 : index
    %c0_66 = arith.constant 0 : index
    %64 = vector.load %arg8[%c2_64, %c2_65, %c0_66] : memref<10x10x128xf32, #tpu.memory_space<vmem>>, vector<8x8x128xf32>
    %65 = vector.shape_cast %64 : vector<8x8x128xf32> to vector<64x128xf32>
    %c8 = arith.constant 8 : index
    %c0_67 = arith.constant 0 : index
    %c0_68 = arith.constant 0 : index
    %66 = vector.load %arg4[%c8, %c0_67, %c0_68] : memref<9x128x128xf32, #tpu.memory_space<vmem>>, vector<1x128x128xf32>
    %67 = vector.shape_cast %66 : vector<1x128x128xf32> to vector<128x128xf32>
    %cst_69 = arith.constant dense<0.000000e+00> : vector<64x128xf32>
    %68 = tpu.matmul %65, %67, %cst_69 {dimension_numbers = #tpu.dot_dimension_numbers<[1], [0], [0], [1], [0, 0, 1, 1], [], []>} : vector<64x128xf32>, vector<128x128xf32>, vector<64x128xf32> -> vector<64x128xf32>
    %69 = arith.addf %63, %68 : vector<64x128xf32>
    %c0_70 = arith.constant 0 : index
    %c0_71 = arith.constant 0 : index
    %c0_72 = arith.constant 0 : index
    %70 = vector.load %arg5[%c0_70, %c0_71, %c0_72] : memref<1x64x128xf32, #tpu.memory_space<vmem>>, vector<1x64x128xf32>
    %71 = vector.shape_cast %70 : vector<1x64x128xf32> to vector<64x128xf32>
    %72 = vector.shape_cast %69 : vector<64x128xf32> to vector<1x64x128xf32>
    tpu.vector_store %arg5[%c0_70, %c0_71, %c0_72], %72 {strides = array<i32>} : memref<1x64x128xf32, #tpu.memory_space<vmem>>, vector<1x64x128xf32>,
    %cst_73 = arith.constant dense<0.000000e+00> : vector<128xf32>
    %73 = vector.multi_reduction <add>, %69, %cst_73 [0] : vector<64x128xf32> to vector<128xf32>
    %74 = vector.shape_cast %73 : vector<128xf32> to vector<1x128xf32>
    %c0_74 = arith.constant 0 : index
    %c0_75 = arith.constant 0 : index
    %c0_76 = arith.constant 0 : index
    %75 = vector.load %arg6[%c0_74, %c0_75, %c0_76] : memref<1x1x128xf32, #tpu.memory_space<vmem>>, vector<1x1x128xf32>
    %76 = vector.shape_cast %75 : vector<1x1x128xf32> to vector<1x128xf32>
    %77 = vector.shape_cast %74 : vector<1x128xf32> to vector<1x1x128xf32>
    tpu.vector_store %arg6[%c0_74, %c0_75, %c0_76], %77 {strides = array<i32>} : memref<1x1x128xf32, #tpu.memory_space<vmem>>, vector<1x1x128xf32>,
    %78 = arith.mulf %69, %69 : vector<64x128xf32>
    %cst_77 = arith.constant dense<0.000000e+00> : vector<128xf32>
    %79 = vector.multi_reduction <add>, %78, %cst_77 [0] : vector<64x128xf32> to vector<128xf32>
    %80 = vector.shape_cast %79 : vector<128xf32> to vector<1x128xf32>
    %c0_78 = arith.constant 0 : index
    %c0_79 = arith.constant 0 : index
    %c0_80 = arith.constant 0 : index
    %81 = vector.load %arg7[%c0_78, %c0_79, %c0_80] : memref<1x1x128xf32, #tpu.memory_space<vmem>>, vector<1x1x128xf32>
    %82 = vector.shape_cast %81 : vector<1x1x128xf32> to vector<1x128xf32>
    %83 = vector.shape_cast %80 : vector<1x128xf32> to vector<1x1x128xf32>
    tpu.vector_store %arg7[%c0_78, %c0_79, %c0_80], %83 {strides = array<i32>} : memref<1x1x128xf32, #tpu.memory_space<vmem>>, vector<1x1x128xf32>,
    return
  }
  func.func @transform_0(%arg0: i32) -> (i32, i32, i32, i32) {
    %c0_i32 = arith.constant 0 : i32
    %c0_i32_0 = arith.constant 0 : i32
    %c0_i32_1 = arith.constant 0 : i32
    %c0_i32_2 = arith.constant 0 : i32
    return %arg0, %c0_i32, %c0_i32_0, %c0_i32_1 : i32, i32, i32, i32
  }
  func.func @transform_1(%arg0: i32) -> (i32, i32) {
    %c0_i32 = arith.constant 0 : i32
    %c0_i32_0 = arith.constant 0 : i32
    %c0_i32_1 = arith.constant 0 : i32
    return %c0_i32, %c0_i32_0 : i32, i32
  }
  func.func @transform_2(%arg0: i32) -> (i32, i32) {
    %c0_i32 = arith.constant 0 : i32
    %c0_i32_0 = arith.constant 0 : i32
    %c0_i32_1 = arith.constant 0 : i32
    return %c0_i32, %c0_i32_0 : i32, i32
  }
  func.func @transform_3(%arg0: i32) -> (i32, i32, i32) {
    %c0_i32 = arith.constant 0 : i32
    %c0_i32_0 = arith.constant 0 : i32
    %c0_i32_1 = arith.constant 0 : i32
    %c0_i32_2 = arith.constant 0 : i32
    return %c0_i32, %c0_i32_0, %c0_i32_1 : i32, i32, i32
  }
  func.func @transform_4(%arg0: i32) -> (i32, i32, i32) {
    %c0_i32 = arith.constant 0 : i32
    %c0_i32_0 = arith.constant 0 : i32
    %c0_i32_1 = arith.constant 0 : i32
    return %arg0, %c0_i32, %c0_i32_0 : i32, i32, i32
  }
  func.func @transform_5(%arg0: i32) -> (i32, i32, i32) {
    %c0_i32 = arith.constant 0 : i32
    %c0_i32_0 = arith.constant 0 : i32
    %c0_i32_1 = arith.constant 0 : i32
    return %arg0, %c0_i32, %c0_i32_0 : i32, i32, i32
  }
  func.func @transform_6(%arg0: i32) -> (i32, i32, i32) {
    %c0_i32 = arith.constant 0 : i32
    %c0_i32_0 = arith.constant 0 : i32
    %c0_i32_1 = arith.constant 0 : i32
    return %arg0, %c0_i32, %c0_i32_0 : i32, i32, i32
  }
}

module attributes {stable_mosaic.version = 11 : i64} {
  func.func @_bnrelu_add_proj_kernel(%arg0: i32, %arg1: memref<1x64x128xf32, #tpu.memory_space<vmem>>, %arg2: memref<1x128xf32, #tpu.memory_space<vmem>>, %arg3: memref<1x128xf32, #tpu.memory_space<vmem>>, %arg4: memref<1x64x4xf32, #tpu.memory_space<vmem>>, %arg5: memref<4x128xf32, #tpu.memory_space<vmem>>, %arg6: memref<1x64x128xf32, #tpu.memory_space<vmem>>) attributes {dimension_semantics = [#tpu.dimension_semantics<parallel>], iteration_bounds = array<i64: 2>, scalar_prefetch = 0 : i64, scratch_operands = 0 : i64, tpu.core_type = #tpu.core_type<tc>, window_params = [{transform_indices = @transform_0, window_bounds = array<i64: 1, 64, 128>}, {pipeline_mode = #tpu.pipeline_mode<synchronous>, transform_indices = @transform_1, window_bounds = array<i64: 1, 128>}, {pipeline_mode = #tpu.pipeline_mode<synchronous>, transform_indices = @transform_2, window_bounds = array<i64: 1, 128>}, {transform_indices = @transform_3, window_bounds = array<i64: 1, 64, 4>}, {pipeline_mode = #tpu.pipeline_mode<synchronous>, transform_indices = @transform_4, window_bounds = array<i64: 4, 128>}, {transform_indices = @transform_5, window_bounds = array<i64: 1, 64, 128>}]} {
    %c0 = arith.constant 0 : index
    %c0_0 = arith.constant 0 : index
    %c0_1 = arith.constant 0 : index
    %0 = vector.load %arg1[%c0, %c0_0, %c0_1] : memref<1x64x128xf32, #tpu.memory_space<vmem>>, vector<1x64x128xf32>
    %1 = vector.shape_cast %0 : vector<1x64x128xf32> to vector<64x128xf32>
    %c0_2 = arith.constant 0 : index
    %c0_3 = arith.constant 0 : index
    %2 = vector.load %arg2[%c0_2, %c0_3] : memref<1x128xf32, #tpu.memory_space<vmem>>, vector<1x128xf32>
    %3 = vector.broadcast %2 : vector<1x128xf32> to vector<64x128xf32>
    %4 = arith.mulf %1, %3 : vector<64x128xf32>
    %c0_4 = arith.constant 0 : index
    %c0_5 = arith.constant 0 : index
    %5 = vector.load %arg3[%c0_4, %c0_5] : memref<1x128xf32, #tpu.memory_space<vmem>>, vector<1x128xf32>
    %6 = vector.broadcast %5 : vector<1x128xf32> to vector<64x128xf32>
    %7 = arith.addf %4, %6 : vector<64x128xf32>
    %cst = arith.constant 0.000000e+00 : f32
    %8 = vector.broadcast %cst : f32 to vector<64x128xf32>
    %9 = arith.maximumf %7, %8 : vector<64x128xf32>
    %c0_6 = arith.constant 0 : index
    %c0_7 = arith.constant 0 : index
    %c0_8 = arith.constant 0 : index
    %10 = vector.load %arg4[%c0_6, %c0_7, %c0_8] : memref<1x64x4xf32, #tpu.memory_space<vmem>>, vector<1x64x4xf32>
    %11 = vector.shape_cast %10 : vector<1x64x4xf32> to vector<64x4xf32>
    %c0_9 = arith.constant 0 : index
    %c0_10 = arith.constant 0 : index
    %12 = vector.load %arg5[%c0_9, %c0_10] : memref<4x128xf32, #tpu.memory_space<vmem>>, vector<4x128xf32>
    %cst_11 = arith.constant dense<0.000000e+00> : vector<64x128xf32>
    %13 = tpu.matmul %11, %12, %cst_11 {dimension_numbers = #tpu.dot_dimension_numbers<[1], [0], [0], [1], [0, 0, 1, 1], [], []>} : vector<64x4xf32>, vector<4x128xf32>, vector<64x128xf32> -> vector<64x128xf32>
    %14 = arith.addf %9, %13 : vector<64x128xf32>
    %c0_12 = arith.constant 0 : index
    %c0_13 = arith.constant 0 : index
    %c0_14 = arith.constant 0 : index
    %15 = vector.load %arg6[%c0_12, %c0_13, %c0_14] : memref<1x64x128xf32, #tpu.memory_space<vmem>>, vector<1x64x128xf32>
    %16 = vector.shape_cast %15 : vector<1x64x128xf32> to vector<64x128xf32>
    %17 = vector.shape_cast %14 : vector<64x128xf32> to vector<1x64x128xf32>
    tpu.vector_store %arg6[%c0_12, %c0_13, %c0_14], %17 {strides = array<i32>} : memref<1x64x128xf32, #tpu.memory_space<vmem>>, vector<1x64x128xf32>,
    return
  }
  func.func @transform_0(%arg0: i32) -> (i32, i32, i32) {
    %c0_i32 = arith.constant 0 : i32
    %c0_i32_0 = arith.constant 0 : i32
    %c0_i32_1 = arith.constant 0 : i32
    return %arg0, %c0_i32, %c0_i32_0 : i32, i32, i32
  }
  func.func @transform_1(%arg0: i32) -> (i32, i32) {
    %c0_i32 = arith.constant 0 : i32
    %c0_i32_0 = arith.constant 0 : i32
    %c0_i32_1 = arith.constant 0 : i32
    return %c0_i32, %c0_i32_0 : i32, i32
  }
  func.func @transform_2(%arg0: i32) -> (i32, i32) {
    %c0_i32 = arith.constant 0 : i32
    %c0_i32_0 = arith.constant 0 : i32
    %c0_i32_1 = arith.constant 0 : i32
    return %c0_i32, %c0_i32_0 : i32, i32
  }
  func.func @transform_3(%arg0: i32) -> (i32, i32, i32) {
    %c0_i32 = arith.constant 0 : i32
    %c0_i32_0 = arith.constant 0 : i32
    %c0_i32_1 = arith.constant 0 : i32
    return %arg0, %c0_i32, %c0_i32_0 : i32, i32, i32
  }
  func.func @transform_4(%arg0: i32) -> (i32, i32) {
    %c0_i32 = arith.constant 0 : i32
    %c0_i32_0 = arith.constant 0 : i32
    %c0_i32_1 = arith.constant 0 : i32
    return %c0_i32, %c0_i32_0 : i32, i32
  }
  func.func @transform_5(%arg0: i32) -> (i32, i32, i32) {
    %c0_i32 = arith.constant 0 : i32
    %c0_i32_0 = arith.constant 0 : i32
    %c0_i32_1 = arith.constant 0 : i32
    return %arg0, %c0_i32, %c0_i32_0 : i32, i32, i32
  }
}

</mosaic_0001>

<bundles_post_ra>
// kernel: preact_block_forward.5
= control target key start
LH: loop header
LB: loop body
LE: loop exit
PB: predicated region body
PF: predicated region fallthrough
CT: control target
= control target key end

     0   :  { %s615_s18 = smov 0   ;;  %s657_s0 = inlined_call_operand.vmem [shape: f32[2,64,128], index: 0, kind: input, shape index: {}]   ;;  %s658_s1 = inlined_call_operand.vmem [shape: f32[1,128], index: 1, kind: input, shape index: {}]   ;;  %s659_s2 = inlined_call_operand.vmem [shape: f32[1,128], index: 2, kind: input, shape index: {}]   ;;  %s660_s3 = inlined_call_operand.vmem [shape: f32[2,64,4], index: 3, kind: input, shape index: {}]   ;;  %s661_s4 = inlined_call_operand.vmem [shape: f32[4,128], index: 4, kind: input, shape index: {}]   ;;  %s662_s5 = inlined_call_operand.vmem [shape: f32[2,64,128], index: 5, kind: output, shape index: {}]  }
   0x1 LB: > { %s517_s19 = sadd.s32 4294967295, %s583_s18   ;;  %p521_p0 = scmp.ge.s32.totalorder %s583_s18, 1  ;;  %s583_s18 = sphi %s615_s18, %s15_s18  }
   0x2   : > { %p197_p1 = scmp.lt.s32.totalorder %s583_s18, 3 }
   0x4   : > { %p198_p2 = pnand %p521_p0, %p197_p1 }
   0x5   : > { %p230_p3 = scmp.lt.s32.totalorder (!%p198_p2), %s517_s19, 1 }
   0x6   : > { %201 = sbr.rel (%p198_p2) target bundleno = 219 (0xdb), region = 40 }
   0xb   : > { %v299_v0 = vld [vmem:[%s661_s4] sm:$0xf]  ;;  %vm325_vm0 = vcmask 1043456   ;;  %s664_s19 = smov (!%p230_p3, %s517_s19), 1  ;;  %vm300_vm1 = vcmask 31744  }
   0xc   : > { %553 = vmatprep.subr.msk.mxu0 %vm325_vm0, %v299_v0  ;;  %567 = vmatprep.subr.msk.mxu1 %vm325_vm0, %v299_v0  ;;  %s626_s22 = sshll.u32 %s664_s19, 6  ;;  %v528_v10 = vld [vmem:[%s658_s1] ss:$0 sm:$0xff] }
   0xd   : > { %554 = vmatpush3.msk.msra.mxu0 %vm325_vm0, %v299_v0  ;;  %568 = vmatpush3.msk.msra.mxu1 %vm325_vm0, %v299_v0  ;;  %s239_s25 = scalar_lea.vmem %s660_s3, %s626_s22  ;;  %s234_s28 = scalar_lea.vmem %s657_s0, %s626_s22  ;;  %v529_v16 = vld [vmem:[%s659_s2] ss:$0 sm:$0xff] }
   0xe   : > { %v291_v1 = vld [vmem:[%s239_s25] sm:$0xff]  ;;  %v292_v3 = vld [vmem:[%s239_s25 + $0x8] sm:$0xff]  ;;  %v293_v5 = vld [vmem:[%s239_s25 + $0x10] sm:$0xff]  ;;  %s244_s10 = scalar_lea.vmem %s662_s5, %s626_s22 }
   0xf   : > { %v295_v2 = vld [vmem:[%s239_s25 + $0x20] sm:$0xff]  ;;  %555 = vmatprep.mubr.msk.f32.mxu0 %vm300_vm1, %v291_v1  ;;  %v296_v4 = vld [vmem:[%s239_s25 + $0x28] sm:$0xff]  ;;  %v297_v6 = vld [vmem:[%s239_s25 + $0x30] sm:$0xff] }
  0x10   : > { %561 = vmatprep.mubr.msk.f32.mxu1 %vm300_vm1, %v295_v2  ;;  %556 = vmatmul.mubr.msk.f32.vlgmr.msra.gmra.mxu0 %vm300_vm1, %v292_v3  ;;  %v294_v7 = vld [vmem:[%s239_s25 + $0x18] sm:$0xff]  ;;  %v246_v9 = vld [vmem:[%s234_s28 + $0x8] sm:$0xff]  ;;  %v245_v12 = vld [vmem:[%s234_s28] sm:$0xff] }
  0x11   : > { %562 = vmatmul.mubr.msk.f32.vlgmr.msra.gmra.mxu1 %vm300_vm1, %v296_v4  ;;  %558 = vmatprep.mubr.msk.f32.mxu0 %vm300_vm1, %v293_v5  ;;  %v298_v8 = vld [vmem:[%s239_s25 + $0x38] sm:$0xff]  ;;  %v250_v11 = vld [vmem:[%s234_s28 + $0x28] sm:$0xff]  ;;  %v249_v13 = vld [vmem:[%s234_s28 + $0x20] sm:$0xff]  ;;  %v261_v14 = vmul.f32 %v528_v10, %v246_v9  ;;  %v260_v19 = vmul.f32 %v528_v10, %v245_v12 }
  0x12   : > { %564 = vmatprep.mubr.msk.f32.mxu1 %vm300_vm1, %v297_v6  ;;  %v265_v15 = vmul.f32 %v528_v10, %v250_v11  ;;  %v248_v17 = vld [vmem:[%s234_s28 + $0x18] sm:$0xff]  ;;  %v264_v20 = vmul.f32 %v528_v10, %v249_v13  ;;  %v247_v21 = vld [vmem:[%s234_s28 + $0x10] sm:$0xff] }
  0x13   : > { %v252_v18 = vld [vmem:[%s234_s28 + $0x38] sm:$0xff]  ;;  %v251_v22 = vld [vmem:[%s234_s28 + $0x30] sm:$0xff]  ;;  %v276_v23 = vadd.f32 %v529_v16, %v261_v14  ;;  %v263_v25 = vmul.f32 %v528_v10, %v248_v17  ;;  %v275_v27 = vadd.f32 %v529_v16, %v260_v19  ;;  %v262_v29 = vmul.f32 %v528_v10, %v247_v21 }
  0x14   : > { %559 = vmatmul.mubr.msk.f32.gmra.mxu0 %vm300_vm1, %v294_v7  ;;  %v280_v24 = vadd.f32 %v529_v16, %v265_v15  ;;  %v267_v26 = vmul.f32 %v528_v10, %v252_v18  ;;  %v279_v28 = vadd.f32 %v529_v16, %v264_v20  ;;  %v266_v30 = vmul.f32 %v528_v10, %v251_v22 }
  0x15   : > { %565 = vmatmul.mubr.msk.f32.gmra.mxu1 %vm300_vm1, %v298_v8  ;;  %v284_v31 = vmax.f32 %v276_v23, 0.0  ;;  %v278_v33 = vadd.f32 %v529_v16, %v263_v25  ;;  %v283_v35 = vmax.f32 %v275_v27, 0.0  ;;  %v277_v37 = vadd.f32 %v529_v16, %v262_v29 }
  0x16   : > { %v288_v32 = vmax.f32 %v280_v24, 0.0  ;;  %v282_v34 = vadd.f32 %v529_v16, %v267_v26  ;;  %v287_v36 = vmax.f32 %v279_v28, 0.0  ;;  %v281_v38 = vadd.f32 %v529_v16, %v266_v30 }
  0x17   : > { %v286_v43 = vmax.f32 %v278_v33, 0.0  ;;  %v285_v49 = vmax.f32 %v277_v37, 0.0 }
  0x18   : > { %v290_v44 = vmax.f32 %v282_v34, 0.0  ;;  %v289_v50 = vmax.f32 %v281_v38, 0.0 }
  0xd0   : > { %v557_v39 = vpop.f32.mrf.mxu0 }
  0xd1   : > { %v563_v40 = vpop.f32.mrf.mxu1  ;;  %v435_v41 = vadd.f32 %v557_v39, %v284_v31 }
  0xd2   : > { %v439_v42 = vadd.f32 %v563_v40, %v288_v32  ;;  %v395_v45 = vpop.f32.mrf.mxu0 }
  0xd3   : > { %v415_v46 = vpop.f32.mrf.mxu1  ;;  %443 = vst [vmem:[%s244_s10 + $0x8] sm:$0xff] %v435_v41  ;;  %v434_v47 = vadd.f32 %v395_v45, %v283_v35 }
  0xd4   : > { %447 = vst [vmem:[%s244_s10 + $0x28] sm:$0xff] %v439_v42  ;;  %v438_v48 = vadd.f32 %v415_v46, %v287_v36  ;;  %v560_v51 = vpop.f32.mrf.mxu0 }
  0xd5   : > { %v566_v52 = vpop.f32.mrf.mxu1  ;;  %442 = vst [vmem:[%s244_s10] sm:$0xff] %v434_v47  ;;  %v437_v53 = vadd.f32 %v560_v51, %v286_v43 }
  0xd6   : > { %446 = vst [vmem:[%s244_s10 + $0x20] sm:$0xff] %v438_v48  ;;  %v441_v54 = vadd.f32 %v566_v52, %v290_v44  ;;  %v405_v55 = vpop.f32.mrf.mxu0 }
  0xd7   : > { %v425_v56 = vpop.f32.mrf.mxu1  ;;  %445 = vst [vmem:[%s244_s10 + $0x18] sm:$0xff] %v437_v53  ;;  %v436_v57 = vadd.f32 %v405_v55, %v285_v49 }
  0xd8   : > { %449 = vst [vmem:[%s244_s10 + $0x38] sm:$0xff] %v441_v54  ;;  %v440_v58 = vadd.f32 %v425_v56, %v289_v50 }
  0xd9   : > { %444 = vst [vmem:[%s244_s10 + $0x10] sm:$0xff] %v436_v57 }
  0xda   : > { %448 = vst [vmem:[%s244_s10 + $0x30] sm:$0xff] %v440_v58 }
  0xdb PF: > { %s15_s18 = sadd.s32 1, %s583_s18  }
  0xdc   : > { %p12_p4 = scmp.ge.s32.totalorder %s15_s18, 4  }
  0xde   :  { %14 = sbr.rel (!%p12_p4) target bundleno = 1 (0x1), region = 73 }

// kernel: preact_block_forward.3
= control target key start
LH: loop header
LB: loop body
LE: loop exit
PB: predicated region body
PF: predicated region fallthrough
CT: control target
= control target key end

     0   :  { %s2111_s15 = smov 0   ;;  %s2427_s0 = inlined_call_operand.vmem [shape: f32[2,36,9,4], index: 0, kind: input, shape index: {}]   ;;  %s2428_s1 = inlined_call_operand.vmem [shape: f32[9,4,128], index: 1, kind: input, shape index: {}]   ;;  %s2429_s2 = inlined_call_operand.vmem [shape: f32[2,64,128], index: 2, kind: output, shape index: {0}]   ;;  %s2430_s3 = inlined_call_operand.vmem [shape: f32[2,1,128], index: 3, kind: output, shape index: {1}]   ;;  %s2431_s4 = inlined_call_operand.vmem [shape: f32[2,1,128], index: 4, kind: output, shape index: {2}]  }
   0x1 LB: > { %s1704_s16 = sadd.s32 4294967295, %s2084_s15   ;;  %p1708_p0 = scmp.ge.s32.totalorder %s2084_s15, 1  ;;  %s2084_s15 = sphi %s2111_s15, %s15_s15  }
   0x2   : > { %p167_p1 = scmp.lt.s32.totalorder %s2084_s15, 3 }
   0x4   : > { %p168_p2 = pnand %p1708_p0, %p167_p1 }
   0x5   : > { %p199_p3 = scmp.lt.s32.totalorder (!%p168_p2), %s1704_s16, 1 }
   0x6   : > { %171 = sbr.rel (%p168_p2) target bundleno = 304 (0x130), region = 28 }
   0xb   : > { %v1720_v0 = vld [vmem:[%s2428_s1 + $0x4] sm:$0xf]  ;;  %vm260_vm0 = vcmask 1043456   ;;  %v223_v1 = vld [vmem:[%s2428_s1] sm:$0xf]  ;;  %s2433_s16 = smov (!%p199_p3, %s1704_s16), 1 }
   0xc   : > { %2067 = vmatprep.subr.msk.mxu1 %vm260_vm0, %v1720_v0  ;;  %1941 = vmatprep.subr.msk.mxu0 %vm260_vm0, %v1720_v0  ;;  %v1739_v2 = vld [vmem:[%s2428_s1 + $0x8] sm:$0xf]  ;;  %s2069_s23 = smul.u32 576, %s2433_s16  ;;  %vm235_vm1 = vcmask 31744   ;;  %v1757_v9 = vld [vmem:[%s2428_s1 + $0xc] sm:$0xf]  ;;  %s211_s21 = scalar_lea.vmem %s2430_s3, %s2433_s16 }
   0xd   : > { %2068 = vmatpush3.msk.msra.mxu1 %vm260_vm0, %v1720_v0  ;;  %1942 = vmatpush3.msk.msra.mxu0 %vm260_vm0, %v1720_v0  ;;  %v1775_v10 = vld [vmem:[%s2428_s1 + $0x10] sm:$0xf]  ;;  %v1793_v19 = vld [vmem:[%s2428_s1 + $0x14] sm:$0xf]  ;;  %v1811_v20 = vld [vmem:[%s2428_s1 + $0x18] sm:$0xf]  ;;  %s214_s24 = scalar_lea.vmem %s2431_s4, %s2433_s16 }
   0xe   : > { %1955 = vmatprep.subr.msk.mxu1 %vm260_vm0, %v223_v1  ;;  %1969 = vmatprep.subr.msk.mxu0 %vm260_vm0, %v1739_v2  ;;  %s2140_s26 = scalar_lea.vmem %s2427_s0, %s2069_s23  ;;  %v1829_v37 = vld [vmem:[%s2428_s1 + $0x1c] sm:$0xf]  ;;  %v1847_v38 = vld [vmem:[%s2428_s1 + $0x20] sm:$0xf]  ;;  %s1859_s13 = sshll.u32 %s2433_s16, 6 }
   0xf   : > { %v1712_v3 = vld [vmem:[%s2140_s26 + $0x90] sm:$0xff]  ;;  %v2147_v5 = vld [vmem:[%s2140_s26 + $0xa0] sm:$0xff]  ;;  %s2403_s18 = scalar_lea.vmem %s2429_s2, %s1859_s13 }
  0x10   : > { %v2144_v4 = vld [vmem:[%s2140_s26 + $0xd0] sm:$0xff]  ;;  %1943 = vmatprep.mubr.msk.f32.mxu0 %vm235_vm1, %v1712_v3  ;;  %v2153_v6 = vld [vmem:[%s2140_s26 + $0xe0] sm:$0xff] }
  0x11   : > { %1949 = vmatprep.mubr.msk.f32.mxu1 %vm235_vm1, %v2144_v4  ;;  %v2156_v7 = vld [vmem:[%s2140_s26 + $0xb0] sm:$0xff]  ;;  %1944 = vmatmul.mubr.msk.f32.vlgmr.msra.gmra.mxu0 %vm235_vm1, %v2147_v5  ;;  %v2174_v11 = vld [vmem:[%s2140_s26 + $0xc0] sm:$0xff] }
  0x12   : > { %v2159_v8 = vld [vmem:[%s2140_s26 + $0xf0] sm:$0xff]  ;;  %1950 = vmatmul.mubr.msk.f32.vlgmr.msra.gmra.mxu1 %vm235_vm1, %v2153_v6  ;;  %1970 = vmatpush3.msk.msra.mxu0 %vm260_vm0, %v1739_v2  ;;  %v2177_v12 = vld [vmem:[%s2140_s26 + $0x100] sm:$0xff] }
  0x13   : > { %1956 = vmatpush3.msk.msra.mxu1 %vm260_vm0, %v223_v1  ;;  %1946 = vmatprep.mubr.msk.f32.mxu0 %vm235_vm1, %v2156_v7  ;;  %v215_v13 = vld [vmem:[%s2140_s26] sm:$0xff]  ;;  %v2194_v15 = vld [vmem:[%s2140_s26 + $0x10] sm:$0xff] }
  0x14   : > { %1952 = vmatprep.mubr.msk.f32.mxu1 %vm235_vm1, %v2159_v8  ;;  %v501_v14 = vld [vmem:[%s2140_s26 + $0x1] sm:$0xff]  ;;  %1983 = vmatprep.subr.msk.mxu1 %vm260_vm0, %v1757_v9  ;;  %v2197_v16 = vld [vmem:[%s2140_s26 + $0x11] sm:$0xff] }
  0x15   : > { %1997 = vmatprep.subr.msk.mxu0 %vm260_vm0, %v1775_v10  ;;  %1947 = vmatmul.mubr.msk.f32.gmra.mxu0 %vm235_vm1, %v2174_v11  ;;  %v2200_v17 = vld [vmem:[%s2140_s26 + $0x20] sm:$0xff]  ;;  %v2218_v21 = vld [vmem:[%s2140_s26 + $0x30] sm:$0xff] }
  0x16   : > { %1953 = vmatmul.mubr.msk.f32.gmra.mxu1 %vm235_vm1, %v2177_v12  ;;  %1971 = vmatprep.mubr.msk.f32.mxu0 %vm235_vm1, %v501_v14  ;;  %v2203_v18 = vld [vmem:[%s2140_s26 + $0x21] sm:$0xff]  ;;  %v2221_v22 = vld [vmem:[%s2140_s26 + $0x31] sm:$0xff] }
  0x17   : > { %1957 = vmatprep.mubr.msk.f32.mxu1 %vm235_vm1, %v215_v13  ;;  %v2228_v23 = vld [vmem:[%s2140_s26 + $0x40] sm:$0xff]  ;;  %v2244_v25 = vld [vmem:[%s2140_s26 + $0x50] sm:$0xff] }
  0x18   : > { %v2231_v24 = vld [vmem:[%s2140_s26 + $0x41] sm:$0xff]  ;;  %v2247_v26 = vld [vmem:[%s2140_s26 + $0x51] sm:$0xff] }
  0x19   : > { %1972 = vmatmul.mubr.msk.f32.vlgmr.msra.gmra.mxu0 %vm235_vm1, %v2197_v16  ;;  %v2250_v27 = vld [vmem:[%s2140_s26 + $0x60] sm:$0xff]  ;;  %v2264_v29 = vld [vmem:[%s2140_s26 + $0x70] sm:$0xff] }
  0x1a   : > { %1958 = vmatmul.mubr.msk.f32.vlgmr.msra.gmra.mxu1 %vm235_vm1, %v2194_v15  ;;  %1998 = vmatpush3.msk.msra.mxu0 %vm260_vm0, %v1775_v10  ;;  %v2253_v28 = vld [vmem:[%s2140_s26 + $0x61] sm:$0xff]  ;;  %v2267_v30 = vld [vmem:[%s2140_s26 + $0x71] sm:$0xff] }
  0x1b   : > { %1984 = vmatpush3.msk.msra.mxu1 %vm260_vm0, %v1757_v9  ;;  %1960 = vmatprep.mubr.msk.f32.mxu1 %vm235_vm1, %v2200_v17  ;;  %v1749_v31 = vld [vmem:[%s2140_s26 + $0x120] sm:$0xff]  ;;  %v1767_v32 = vld [vmem:[%s2140_s26 + $0x1b0] sm:$0xff] }
  0x1c   : > { %1974 = vmatprep.mubr.msk.f32.mxu0 %vm235_vm1, %v2203_v18  ;;  %2011 = vmatprep.subr.msk.mxu1 %vm260_vm0, %v1793_v19  ;;  %v1750_v33 = vld [vmem:[%s2140_s26 + $0x130] sm:$0xff]  ;;  %v1768_v34 = vld [vmem:[%s2140_s26 + $0x1c0] sm:$0xff] }
  0x1d   : > { %2025 = vmatprep.subr.msk.mxu0 %vm260_vm0, %v1811_v20  ;;  %1975 = vmatmul.mubr.msk.f32.gmra.mxu0 %vm235_vm1, %v2221_v22  ;;  %v1751_v35 = vld [vmem:[%s2140_s26 + $0x140] sm:$0xff]  ;;  %v1769_v36 = vld [vmem:[%s2140_s26 + $0x1d0] sm:$0xff] }
  0x1e   : > { %1961 = vmatmul.mubr.msk.f32.gmra.mxu1 %vm235_vm1, %v2218_v21  ;;  %1977 = vmatprep.mubr.msk.f32.mxu0 %vm235_vm1, %v2231_v24  ;;  %v1752_v39 = vld [vmem:[%s2140_s26 + $0x150] sm:$0xff]  ;;  %v1770_v40 = vld [vmem:[%s2140_s26 + $0x1e0] sm:$0xff] }
  0x1f   : > { %1963 = vmatprep.mubr.msk.f32.mxu1 %vm235_vm1, %v2228_v23  ;;  %v1753_v41 = vld [vmem:[%s2140_s26 + $0x160] sm:$0xff]  ;;  %v1771_v42 = vld [vmem:[%s2140_s26 + $0x1f0] sm:$0xff] }
  0x20   : > { %v1754_v43 = vld [vmem:[%s2140_s26 + $0x170] sm:$0xff]  ;;  %v1772_v44 = vld [vmem:[%s2140_s26 + $0x200] sm:$0xff] }
  0x21   : > { %1978 = vmatmul.mubr.msk.f32.gmra.mxu0 %vm235_vm1, %v2247_v26  ;;  %v1755_v45 = vld [vmem:[%s2140_s26 + $0x180] sm:$0xff]  ;;  %v1773_v46 = vld [vmem:[%s2140_s26 + $0x210] sm:$0xff] }
  0x22   : > { %1964 = vmatmul.mubr.msk.f32.gmra.mxu1 %vm235_vm1, %v2244_v25  ;;  %1980 = vmatprep.mubr.msk.f32.mxu0 %vm235_vm1, %v2253_v28  ;;  %v1756_v47 = vld [vmem:[%s2140_s26 + $0x190] sm:$0xff]  ;;  %v1774_v48 = vld [vmem:[%s2140_s26 + $0x220] sm:$0xff] }
  0x23   : > { %1966 = vmatprep.mubr.msk.f32.mxu1 %vm235_vm1, %v2250_v27  ;;  %v1785_v49 = vld [vmem:[%s2140_s26 + $0x121] sm:$0xff]  ;;  %v1786_v50 = vld [vmem:[%s2140_s26 + $0x131] sm:$0xff] }
  0x24   : > { %v1787_v51 = vld [vmem:[%s2140_s26 + $0x141] sm:$0xff]  ;;  %v1788_v52 = vld [vmem:[%s2140_s26 + $0x151] sm:$0xff] }
  0x25   : > { %1981 = vmatmul.mubr.msk.f32.gmra.mxu0 %vm235_vm1, %v2267_v30  ;;  %v1789_v53 = vld [vmem:[%s2140_s26 + $0x161] sm:$0xff]  ;;  %v1790_v54 = vld [vmem:[%s2140_s26 + $0x171] sm:$0xff] }
  0x26   : > { %1967 = vmatmul.mubr.msk.f32.gmra.mxu1 %vm235_vm1, %v2264_v29  ;;  %1999 = vmatprep.mubr.msk.f32.mxu0 %vm235_vm1, %v1767_v32  ;;  %v1791_v55 = vld [vmem:[%s2140_s26 + $0x181] sm:$0xff]  ;;  %v1792_v56 = vld [vmem:[%s2140_s26 + $0x191] sm:$0xff] }
  0x27   : > { %1985 = vmatprep.mubr.msk.f32.mxu1 %vm235_vm1, %v1749_v31  ;;  %v1810_v57 = vld [vmem:[%s2140_s26 + $0x80] sm:$0xff]  ;;  %v1828_v58 = vld [vmem:[%s2140_s26 + $0x110] sm:$0xff] }
  0x28   : > { %v1846_v59 = vld [vmem:[%s2140_s26 + $0x81] sm:$0xff] }
  0x29   : > { %2000 = vmatmul.mubr.msk.f32.vlgmr.msra.gmra.mxu0 %vm235_vm1, %v1768_v34 }
  0x2a   : > { %1986 = vmatmul.mubr.msk.f32.vlgmr.msra.gmra.mxu1 %vm235_vm1, %v1750_v33  ;;  %2026 = vmatpush3.msk.msra.mxu0 %vm260_vm0, %v1811_v20 }
  0x2b   : > { %2012 = vmatpush3.msk.msra.mxu1 %vm260_vm0, %v1793_v19  ;;  %1988 = vmatprep.mubr.msk.f32.mxu1 %vm235_vm1, %v1751_v35 }
  0x2c   : > { %2002 = vmatprep.mubr.msk.f32.mxu0 %vm235_vm1, %v1769_v36  ;;  %2039 = vmatprep.subr.msk.mxu1 %vm260_vm0, %v1829_v37 }
  0x2d   : > { %2053 = vmatprep.subr.msk.mxu0 %vm260_vm0, %v1847_v38  ;;  %2003 = vmatmul.mubr.msk.f32.gmra.mxu0 %vm235_vm1, %v1770_v40 }
  0x2e   : > { %1989 = vmatmul.mubr.msk.f32.gmra.mxu1 %vm235_vm1, %v1752_v39  ;;  %2005 = vmatprep.mubr.msk.f32.mxu0 %vm235_vm1, %v1771_v42 }
  0x2f   : > { %1991 = vmatprep.mubr.msk.f32.mxu1 %vm235_vm1, %v1753_v41 }
  0x31   : > { %2006 = vmatmul.mubr.msk.f32.gmra.mxu0 %vm235_vm1, %v1772_v44 }
  0x32   : > { %1992 = vmatmul.mubr.msk.f32.gmra.mxu1 %vm235_vm1, %v1754_v43  ;;  %2008 = vmatprep.mubr.msk.f32.mxu0 %vm235_vm1, %v1773_v46 }
  0x33   : > { %1994 = vmatprep.mubr.msk.f32.mxu1 %vm235_vm1, %v1755_v45 }
  0x35   : > { %2009 = vmatmul.mubr.msk.f32.gmra.mxu0 %vm235_vm1, %v1774_v48 }
  0x36   : > { %1995 = vmatmul.mubr.msk.f32.gmra.mxu1 %vm235_vm1, %v1756_v47  ;;  %2027 = vmatprep.mubr.msk.f32.mxu0 %vm235_vm1, %v2194_v15 }
  0x37   : > { %2013 = vmatprep.mubr.msk.f32.mxu1 %vm235_vm1, %v1785_v49 }
  0x39   : > { %2028 = vmatmul.mubr.msk.f32.vlgmr.msra.gmra.mxu0 %vm235_vm1, %v2200_v17 }
  0x3a   : > { %2014 = vmatmul.mubr.msk.f32.vlgmr.msra.gmra.mxu1 %vm235_vm1, %v1786_v50  ;;  %2054 = vmatpush3.msk.msra.mxu0 %vm260_vm0, %v1847_v38 }
  0x3b   : > { %2040 = vmatpush3.msk.msra.mxu1 %vm260_vm0, %v1829_v37  ;;  %2016 = vmatprep.mubr.msk.f32.mxu1 %vm235_vm1, %v1787_v51 }
  0x3c   : > { %2030 = vmatprep.mubr.msk.f32.mxu0 %vm235_vm1, %v2218_v21 }
  0x3d   : > { %2031 = vmatmul.mubr.msk.f32.gmra.mxu0 %vm235_vm1, %v2228_v23 }
  0x3e   : > { %2017 = vmatmul.mubr.msk.f32.gmra.mxu1 %vm235_vm1, %v1788_v52  ;;  %2033 = vmatprep.mubr.msk.f32.mxu0 %vm235_vm1, %v2244_v25 }
  0x3f   : > { %2019 = vmatprep.mubr.msk.f32.mxu1 %vm235_vm1, %v1789_v53 }
  0x41   : > { %2034 = vmatmul.mubr.msk.f32.gmra.mxu0 %vm235_vm1, %v2250_v27 }
  0x42   : > { %2020 = vmatmul.mubr.msk.f32.gmra.mxu1 %vm235_vm1, %v1790_v54  ;;  %2036 = vmatprep.mubr.msk.f32.mxu0 %vm235_vm1, %v2264_v29 }
  0x43   : > { %2022 = vmatprep.mubr.msk.f32.mxu1 %vm235_vm1, %v1791_v55 }
  0x45   : > { %2037 = vmatmul.mubr.msk.f32.gmra.mxu0 %vm235_vm1, %v1810_v57 }
  0x46   : > { %2023 = vmatmul.mubr.msk.f32.gmra.mxu1 %vm235_vm1, %v1792_v56  ;;  %2055 = vmatprep.mubr.msk.f32.mxu0 %vm235_vm1, %v2197_v16 }
  0x47   : > { %2041 = vmatprep.mubr.msk.f32.mxu1 %vm235_vm1, %v2147_v5 }
  0x49   : > { %2056 = vmatmul.mubr.msk.f32.vlgmr.msra.gmra.mxu0 %vm235_vm1, %v2203_v18 }
  0x4a   : > { %2042 = vmatmul.mubr.msk.f32.vlgmr.msra.gmra.mxu1 %vm235_vm1, %v2156_v7  ;;  %2058 = vmatprep.mubr.msk.f32.mxu0 %vm235_vm1, %v2221_v22 }
  0x4b   : > { %2044 = vmatprep.mubr.msk.f32.mxu1 %vm235_vm1, %v2174_v11 }
  0x4d   : > { %2059 = vmatmul.mubr.msk.f32.gmra.mxu0 %vm235_vm1, %v2231_v24 }
  0x4e   : > { %2045 = vmatmul.mubr.msk.f32.gmra.mxu1 %vm235_vm1, %v2144_v4  ;;  %2061 = vmatprep.mubr.msk.f32.mxu0 %vm235_vm1, %v2247_v26 }
  0x4f   : > { %2047 = vmatprep.mubr.msk.f32.mxu1 %vm235_vm1, %v2153_v6 }
  0x51   : > { %2062 = vmatmul.mubr.msk.f32.gmra.mxu0 %vm235_vm1, %v2253_v28 }
  0x52   : > { %2048 = vmatmul.mubr.msk.f32.gmra.mxu1 %vm235_vm1, %v2159_v8  ;;  %2064 = vmatprep.mubr.msk.f32.mxu0 %vm235_vm1, %v2267_v30 }
  0x53   : > { %2050 = vmatprep.mubr.msk.f32.mxu1 %vm235_vm1, %v2177_v12 }
  0x55   : > { %2065 = vmatmul.mubr.msk.f32.gmra.mxu0 %vm235_vm1, %v1846_v59 }
  0x56   : > { %2051 = vmatmul.mubr.msk.f32.gmra.mxu1 %vm235_vm1, %v1828_v58 }
  0xd1   : > { %v1945_v60 = vpop.f32.mrf.mxu0 }
  0xd2   : > { %v1951_v61 = vpop.f32.mrf.mxu1 }
  0xd3   : > { %v330_v62 = vpop.f32.mrf.mxu0 }
  0xd4   : > { %v350_v63 = vpop.f32.mrf.mxu1 }
  0xd5   : > { %v1948_v0 = vpop.f32.mrf.mxu0 }
  0xd6   : > { %v2381_v1 = vpop.f32.mrf.mxu1 }
  0xd7   : > { %v340_v2 = vpop.f32.mrf.mxu0 }
  0xd8   : > { %v2383_v3 = vpop.f32.mrf.mxu1 }
  0xd9   : > { %v1973_v5 = vpop.f32.mrf.mxu0 }
  0xda   : > { %v1959_v4 = vpop.f32.mrf.mxu1 }
  0xdb   : > { %v604_v7 = vpop.f32.mrf.mxu0  ;;  %v468_v36 = vadd.f32 %v1959_v4, %v1945_v60 }
  0xdc   : > { %v462_v6 = vpop.f32.mrf.mxu1 }
  0xdd   : > { %v1976_v9 = vpop.f32.mrf.mxu0  ;;  %v463_v39 = vadd.f32 %v462_v6, %v330_v62  ;;  %v644_v42 = vadd.f32 %v1973_v5, %v468_v36 }
  0xde   : > { %v1962_v8 = vpop.f32.mrf.mxu1 }
  0xdf   : > { %v614_v11 = vpop.f32.mrf.mxu0  ;;  %v478_v43 = vadd.f32 %v1962_v8, %v1948_v0  ;;  %v643_v46 = vadd.f32 %v604_v7, %v463_v39 }
  0xe0   : > { %v472_v10 = vpop.f32.mrf.mxu1 }
  0xe1   : > { %v1979_v13 = vpop.f32.mrf.mxu0  ;;  %v473_v47 = vadd.f32 %v472_v10, %v340_v2  ;;  %v646_v51 = vadd.f32 %v1976_v9, %v478_v43 }
  0xe2   : > { %v1965_v12 = vpop.f32.mrf.mxu1 }
  0xe3   : > { %v624_v15 = vpop.f32.mrf.mxu0  ;;  %v488_v52 = vadd.f32 %v1965_v12, %v1951_v61  ;;  %v645_v57 = vadd.f32 %v614_v11, %v473_v47 }
  0xe4   : > { %v482_v14 = vpop.f32.mrf.mxu1 }
  0xe5   : > { %v2385_v17 = vpop.f32.mrf.mxu0  ;;  %v483_v54 = vadd.f32 %v482_v14, %v350_v63  ;;  %v648_v4 = vadd.f32 %v1979_v13, %v488_v52 }
  0xe6   : > { %v1968_v16 = vpop.f32.mrf.mxu1 }
  0xe7   : > { %v2387_v19 = vpop.f32.mrf.mxu0  ;;  %v647_v2 = vadd.f32 %v624_v15, %v483_v54  ;;  %v498_v7 = vadd.f32 %v1968_v16, %v2381_v1 }
  0xe8   : > { %v492_v18 = vpop.f32.mrf.mxu1 }
  0xe9   : > { %v2001_v21 = vpop.f32.mrf.mxu0  ;;  %v493_v8 = vadd.f32 %v492_v18, %v2383_v3 }
  0xea   : > { %v1987_v20 = vpop.f32.mrf.mxu1 }
  0xeb   : > { %v906_v23 = vpop.f32.mrf.mxu0  ;;  %v795_v48 = vadd.f32 %v1987_v20, %v644_v42  ;;  %v649_v15 = vadd.f32 %v2387_v19, %v493_v8 }
  0xec   : > { %v755_v22 = vpop.f32.mrf.mxu1 }
  0xed   : > { %v2004_v25 = vpop.f32.mrf.mxu0  ;;  %v794_v53 = vadd.f32 %v755_v22, %v643_v46  ;;  %v946_v58 = vadd.f32 %v2001_v21, %v795_v48 }
  0xee   : > { %v1990_v24 = vpop.f32.mrf.mxu1 }
  0xef   : > { %v916_v27 = vpop.f32.mrf.mxu0  ;;  %v797_v59 = vadd.f32 %v1990_v24, %v646_v51  ;;  %v945_v0 = vadd.f32 %v906_v23, %v794_v53  ;;  %v650_v23 = vadd.f32 %v2385_v17, %v498_v7 }
  0xf0   : > { %v765_v26 = vpop.f32.mrf.mxu1 }
  0xf1   : > { %v2007_v29 = vpop.f32.mrf.mxu0  ;;  %v796_v5 = vadd.f32 %v765_v26, %v645_v57  ;;  %v948_v63 = vadd.f32 %v2004_v25, %v797_v59 }
  0xf2   : > { %v1993_v28 = vpop.f32.mrf.mxu1 }
  0xf3   : > { %v926_v31 = vpop.f32.mrf.mxu0  ;;  %v799_v10 = vadd.f32 %v1993_v28, %v648_v4  ;;  %v947_v21 = vadd.f32 %v916_v27, %v796_v5 }
  0xf4   : > { %v775_v30 = vpop.f32.mrf.mxu1 }
  0xf5   : > { %v2389_v33 = vpop.f32.mrf.mxu0  ;;  %v798_v12 = vadd.f32 %v775_v30, %v647_v2  ;;  %v950_v3 = vadd.f32 %v2007_v29, %v799_v10 }
  0xf6   : > { %v1996_v32 = vpop.f32.mrf.mxu1 }
  0xf7   : > { %v2391_v35 = vpop.f32.mrf.mxu0  ;;  %v949_v25 = vadd.f32 %v926_v31, %v798_v12  ;;  %v801_v28 = vadd.f32 %v1996_v32, %v650_v23 }
  0xf8   : > { %v785_v34 = vpop.f32.mrf.mxu1 }
  0xf9   : > { %v2029_v38 = vpop.f32.mrf.mxu0  ;;  %v800_v36 = vadd.f32 %v785_v34, %v649_v15  ;;  %v952_v34 = vadd.f32 %v2389_v33, %v801_v28 }
  0xfa   : > { %v2015_v37 = vpop.f32.mrf.mxu1 }
  0xfb   : > { %v1207_v41 = vpop.f32.mrf.mxu0  ;;  %v1096_v6 = vadd.f32 %v2015_v37, %v946_v58  ;;  %v951_v42 = vadd.f32 %v2391_v35, %v800_v36 }
  0xfc   : > { %v1056_v40 = vpop.f32.mrf.mxu1 }
  0xfd   : > { %v2032_v45 = vpop.f32.mrf.mxu0  ;;  %v1095_v11 = vadd.f32 %v1056_v40, %v945_v0  ;;  %v1247_v13 = vadd.f32 %v2029_v38, %v1096_v6 }
  0xfe   : > { %v2018_v44 = vpop.f32.mrf.mxu1 }
  0xff   : > { %v1217_v50 = vpop.f32.mrf.mxu0  ;;  %v1098_v22 = vadd.f32 %v2018_v44, %v948_v63  ;;  %v1246_v18 = vadd.f32 %v1207_v41, %v1095_v11 }
 0x100   : > { %v1066_v49 = vpop.f32.mrf.mxu1 }
 0x101   : > { %v2035_v56 = vpop.f32.mrf.mxu0  ;;  %v1097_v24 = vadd.f32 %v1066_v49, %v947_v21  ;;  %v1249_v17 = vadd.f32 %v2032_v45, %v1098_v22 }
 0x102   : > { %v2021_v55 = vpop.f32.mrf.mxu1 }
 0x103   : > { %v1227_v62 = vpop.f32.mrf.mxu0  ;;  %v1100_v19 = vadd.f32 %v2021_v55, %v950_v3  ;;  %v1248_v40 = vadd.f32 %v1217_v50, %v1097_v24 }
 0x104   : > { %v1076_v60 = vpop.f32.mrf.mxu1 }
 0x105   : > { %v2395_v9 = vpop.f32.mrf.mxu0  ;;  %v1099_v41 = vadd.f32 %v1076_v60, %v949_v25  ;;  %v1251_v46 = vadd.f32 %v2035_v56, %v1100_v19 }
 0x106   : > { %v2024_v61 = vpop.f32.mrf.mxu1 }
 0x107   : > { %v1237_v20 = vpop.f32.mrf.mxu0  ;;  %v1102_v49 = vadd.f32 %v2024_v61, %v952_v34  ;;  %v1250_v54 = vadd.f32 %v1227_v62, %v1099_v41 }
 0x108   : > { %v1086_v14 = vpop.f32.mrf.mxu1 }
 0x109   : > { %v2057_v16 = vpop.f32.mrf.mxu0  ;;  %v1101_v51 = vadd.f32 %v1086_v14, %v951_v42  ;;  %v1253_v5 = vadd.f32 %v2395_v9, %v1102_v49 }
 0x10a   : > { %v2043_v1 = vpop.f32.mrf.mxu1 }
 0x10b   : > { %v1398_v26 = vadd.f32 %v2043_v1, %v1247_v13  ;;  %v1508_v30 = vpop.f32.mrf.mxu0  ;;  %v1252_v6 = vadd.f32 %v1237_v20, %v1101_v51 }
 0x10c   : > { %v1358_v27 = vpop.f32.mrf.mxu1 }
 0x10d   : > { %v1548_v37 = vadd.f32 %v2057_v16, %v1398_v26  ;;  %v1397_v38 = vadd.f32 %v1358_v27, %v1246_v18  ;;  %v2060_v39 = vpop.f32.mrf.mxu0 }
 0x10e   : > { %v2046_v29 = vpop.f32.mrf.mxu1 }
 0x10f   : > { %1556 = vst [vmem:[%s2403_s18 + $0x8] sm:$0xff] %v1548_v37  ;;  %v1547_v31 = vadd.f32 %v1508_v30, %v1397_v38  ;;  %v1400_v32 = vadd.f32 %v2046_v29, %v1249_v17  ;;  %v1518_v44 = vpop.f32.mrf.mxu0  ;;  %v1578_v50 = vmul.f32 %v1548_v37, %v1548_v37 }
 0x110   : > { %v1368_v43 = vpop.f32.mrf.mxu1 }
 0x111   : > { %1555 = vst [vmem:[%s2403_s18] sm:$0xff] %v1547_v31  ;;  %v1577_v45 = vmul.f32 %v1547_v31, %v1547_v31  ;;  %v1550_v47 = vadd.f32 %v2060_v39, %v1400_v32  ;;  %v1399_v48 = vadd.f32 %v1368_v43, %v1248_v40  ;;  %v2063_v53 = vpop.f32.mrf.mxu0  ;;  %v1563_v55 = vadd.f32 %v1548_v37, %v1547_v31 }
 0x112   : > { %v2049_v52 = vpop.f32.mrf.mxu1 }
 0x113   : > { %1558 = vst [vmem:[%s2403_s18 + $0x18] sm:$0xff] %v1550_v47  ;;  %v1549_v33 = vadd.f32 %v1518_v44, %v1399_v48  ;;  %v1402_v57 = vadd.f32 %v2049_v52, %v1251_v46  ;;  %v1585_v35 = vadd.f32 %v1578_v50, %v1577_v45  ;;  %v1528_v59 = vpop.f32.mrf.mxu0  ;;  %v1580_v62 = vmul.f32 %v1550_v47, %v1550_v47 }
 0x114   : > { %v1378_v58 = vpop.f32.mrf.mxu1 }
 0x115   : > { %1557 = vst [vmem:[%s2403_s18 + $0x10] sm:$0xff] %v1549_v33  ;;  %v1564_v56 = vadd.f32 %v1563_v55, %v1549_v33  ;;  %v1579_v60 = vmul.f32 %v1549_v33, %v1549_v33  ;;  %v1552_v4 = vadd.f32 %v2063_v53, %v1402_v57  ;;  %v1401_v0 = vadd.f32 %v1378_v58, %v1250_v54  ;;  %v2066_v7 = vpop.f32.mrf.mxu0 }
 0x116   : > { %v2052_v2 = vpop.f32.mrf.mxu1 }
 0x117   : > { %v1586_v8 = vadd.f32 %v1585_v35, %v1579_v60  ;;  %1560 = vst [vmem:[%s2403_s18 + $0x28] sm:$0xff] %v1552_v4  ;;  %v1551_v61 = vadd.f32 %v1528_v59, %v1401_v0  ;;  %v1565_v63 = vadd.f32 %v1564_v56, %v1550_v47  ;;  %v1404_v10 = vadd.f32 %v2052_v2, %v1253_v5  ;;  %v1538_v23 = vpop.f32.mrf.mxu0 }
 0x118   : > { %v1388_v11 = vpop.f32.mrf.mxu1  ;;  %v1582_v9 = vmul.f32 %v1552_v4, %v1552_v4 }
 0x119   : > { %1559 = vst [vmem:[%s2403_s18 + $0x20] sm:$0xff] %v1551_v61  ;;  %v1566_v12 = vadd.f32 %v1565_v63, %v1551_v61  ;;  %v1581_v14 = vmul.f32 %v1551_v61, %v1551_v61  ;;  %v1587_v21 = vadd.f32 %v1586_v8, %v1580_v62  ;;  %v1403_v13 = vadd.f32 %v1388_v11, %v1252_v6 }
 0x11a   : > { %v1554_v22 = vadd.f32 %v2066_v7, %v1404_v10 }
 0x11b   : > { %v1588_v20 = vadd.f32 %v1587_v21, %v1581_v14  ;;  %v1553_v15 = vadd.f32 %v1538_v23, %v1403_v13  ;;  %v1567_v1 = vadd.f32 %v1566_v12, %v1552_v4 }
 0x11c   : > { %1562 = vst [vmem:[%s2403_s18 + $0x38] sm:$0xff] %v1554_v22  ;;  %v1584_v24 = vmul.f32 %v1554_v22, %v1554_v22 }
 0x11d   : > { %1561 = vst [vmem:[%s2403_s18 + $0x30] sm:$0xff] %v1553_v15  ;;  %v1568_v16 = vadd.f32 %v1567_v1, %v1553_v15  ;;  %v1583_v3 = vmul.f32 %v1553_v15, %v1553_v15  ;;  %v1589_v18 = vadd.f32 %v1588_v20, %v1582_v9 }
 0x11f   : > { %v1569_v26 = vadd.f32 %v1568_v16, %v1554_v22  ;;  %v1590_v25 = vadd.f32 %v1589_v18, %v1583_v3 }
 0x121   : > { %v1570_v28 = vrot.slane %v1569_v26, 4  ;;  %v1591_v36 = vadd.f32 %v1590_v25, %v1584_v24 }
 0x123   : > { %v1571_v27 = vadd.f32 %v1570_v28, %v1569_v26  ;;  %v1592_v30 = vrot.slane %v1591_v36, 4 }
 0x125   : > { %v1572_v17 = vrot.slane %v1571_v27, 2  ;;  %v1593_v19 = vadd.f32 %v1592_v30, %v1591_v36 }
 0x127   : > { %v1573_v37 = vadd.f32 %v1572_v17, %v1571_v27  ;;  %v1594_v38 = vrot.slane %v1593_v19, 2 }
 0x129   : > { %v1574_v29 = vrot.slane %v1573_v37, 1  ;;  %v1595_v39 = vadd.f32 %v1594_v38, %v1593_v19 }
 0x12b   : > { %v1575_v40 = vadd.f32 %v1574_v29, %v1573_v37  ;;  %v1596_v41 = vrot.slane %v1595_v39, 1 }
 0x12d   : > { %1576 = vst [vmem:[%s211_s21] sm:$0x1] %v1575_v40  ;;  %v1597_v31 = vadd.f32 %v1596_v41, %v1595_v39 }
 0x12f   : > { %1598 = vst [vmem:[%s214_s24] sm:$0x1] %v1597_v31 }
 0x130 PF: > { %s15_s15 = sadd.s32 1, %s2084_s15  }
 0x131   : > { %p12_p4 = scmp.ge.s32.totalorder %s15_s15, 4  }
 0x133   :  { %14 = sbr.rel (!%p12_p4) target bundleno = 1 (0x1), region = 95 }

// kernel: preact_block_forward.4
= control target key start
LH: loop header
LB: loop body
LE: loop exit
PB: predicated region body
PF: predicated region fallthrough
CT: control target
= control target key end

     0   :  { %s2560_s21 = smov 0   ;;  %s3235_s0 = inlined_call_operand.vmem [shape: f32[2,8,8,128], index: 0, kind: input, shape index: {}]   ;;  %s3236_s1 = inlined_call_operand.vmem [shape: f32[1,128], index: 1, kind: input, shape index: {}]   ;;  %s3237_s2 = inlined_call_operand.vmem [shape: f32[1,128], index: 2, kind: input, shape index: {}]   ;;  %s3238_s3 = inlined_call_operand.vmem [shape: f32[9,128,128], index: 3, kind: input, shape index: {}]   ;;  %s3239_s4 = inlined_call_operand.vmem [shape: f32[2,64,128], index: 4, kind: output, shape index: {0}]   ;;  %s3240_s5 = inlined_call_operand.vmem [shape: f32[2,1,128], index: 5, kind: output, shape index: {1}]   ;;  %s3241_s6 = inlined_call_operand.vmem [shape: f32[2,1,128], index: 6, kind: output, shape index: {2}]  }
   0x1 LB: > { %s1719_s22 = sadd.s32 4294967295, %s2522_s21   ;;  %p1723_p0 = scmp.ge.s32.totalorder %s2522_s21, 1  ;;  %s2522_s21 = sphi %s2560_s21, %s17_s21  }
   0x2   : > { %p217_p1 = scmp.lt.s32.totalorder %s2522_s21, 3 }
   0x4   : > { %p218_p2 = pnand %p1723_p0, %p217_p1 }
   0x6   : > { %221 = sbr.rel (%p218_p2) target bundleno = 433 (0x1b1), region = 36 }
   0xb   : > { %v1745_v0 = vld [vmem:[%s3238_s3 + $0xf8] sm:$0xff]  ;;  %v1744_v2 = vld [vmem:[%s3238_s3 + $0xf0] sm:$0xff]  ;;  %p2579_p3 = scmp.lt.s32.totalorder %s1719_s22, 1  ;;  %v2524_v4 = vmov 0.0   ;;  %v1743_v5 = vld [vmem:[%s3238_s3 + $0xe8] sm:$0xff] }
   0xc   : > { %v367_v1 = vld [vmem:[%s3238_s3 + $0x78] sm:$0xff]  ;;  %2078 = vmatprep.subr.mxu0 %v1745_v0  ;;  %v366_v3 = vld [vmem:[%s3238_s3 + $0x70] sm:$0xff]  ;;  %315 = vst [vmem:[#allocation2] sm:$0xff] %v2524_v4  ;;  %316 = vst [vmem:[#allocation2 + $0x8] sm:$0x3] %v2524_v4  ;;  %2154 = vmatprep.mubr.f32.mxu1 %v2524_v4 }
   0xd   : > { %2122 = vmatprep.subr.mxu1 %v367_v1  ;;  %317 = vst [vmem:[#allocation2 + $0x10] sm:$0xff] %v2524_v4  ;;  %318 = vst [vmem:[#allocation2 + $0x18] sm:$0x3] %v2524_v4  ;;  %2079 = vmatpush3.msra.mxu0 %v1745_v0  ;;  %v365_v6 = vld [vmem:[%s3238_s3 + $0x68] sm:$0xff]  ;;  %s3252_s22 = smov (!%p2579_p3, %s1719_s22), 1  ;;  %v1742_v7 = vld [vmem:[%s3238_s3 + $0xe0] sm:$0xff] }
   0xe   : > { %319 = vst [vmem:[#allocation2 + $0x20] sm:$0xff] %v2524_v4  ;;  %320 = vst [vmem:[#allocation2 + $0x28] sm:$0x3] %v2524_v4  ;;  %2123 = vmatpush3.msra.mxu1 %v367_v1  ;;  %2080 = vmatprep.subr.mxu0 %v1744_v2  ;;  %v364_v8 = vld [vmem:[%s3238_s3 + $0x60] sm:$0xff]  ;;  %s1860_s16 = sshll.u32 %s3252_s22, 6  ;;  %v1741_v9 = vld [vmem:[%s3238_s3 + $0xd8] sm:$0xff]  ;;  %s265_s7 = scalar_lea.vmem %s3240_s5, %s3252_s22 }
   0xf   : > { %321 = vst [vmem:[#allocation2 + $0x30] sm:$0xff] %v2524_v4  ;;  %322 = vst [vmem:[#allocation2 + $0x38] sm:$0x3] %v2524_v4  ;;  %2124 = vmatprep.subr.mxu1 %v366_v3  ;;  %2081 = vmatpush3.msra.mxu0 %v1744_v2  ;;  %v363_v10 = vld [vmem:[%s3238_s3 + $0x58] sm:$0xff]  ;;  %v1740_v11 = vld [vmem:[%s3238_s3 + $0xd0] sm:$0xff]  ;;  %s2642_s29 = scalar_lea.vmem %s3235_s0, %s1860_s16  ;;  %s3212_s28 = scalar_lea.vmem %s3239_s4, %s1860_s16 }
  0x10   : > { %323 = vst [vmem:[#allocation2 + $0x40] sm:$0xff] %v2524_v4  ;;  %324 = vst [vmem:[#allocation2 + $0x48] sm:$0x3] %v2524_v4  ;;  %2125 = vmatpush3.msra.mxu1 %v366_v3  ;;  %2082 = vmatprep.subr.mxu0 %v1743_v5  ;;  %v362_v12 = vld [vmem:[%s3238_s3 + $0x50] sm:$0xff]  ;;  %v1739_v13 = vld [vmem:[%s3238_s3 + $0xc8] sm:$0xff]  ;;  %s268_s10 = scalar_lea.vmem %s3241_s6, %s3252_s22 }
  0x11   : > { %325 = vst [vmem:[#allocation2 + $0x50] sm:$0xff] %v2524_v4  ;;  %326 = vst [vmem:[#allocation2 + $0x58] sm:$0x3] %v2524_v4  ;;  %2126 = vmatprep.subr.mxu1 %v365_v6  ;;  %2083 = vmatpush3.msra.mxu0 %v1743_v5  ;;  %v361_v14 = vld [vmem:[%s3238_s3 + $0x48] sm:$0xff]  ;;  %v269_v15 = vld [vmem:[%s2642_s29] sm:$0xff] }
  0x12   : > { %327 = vst [vmem:[#allocation2 + $0x60] sm:$0xff] %v2524_v4  ;;  %328 = vst [vmem:[#allocation2 + $0x68] sm:$0x3] %v2524_v4  ;;  %2127 = vmatpush3.msra.mxu1 %v365_v6  ;;  %2084 = vmatprep.subr.mxu0 %v1742_v7  ;;  %v2654_v16 = vld [vmem:[%s3236_s1] ss:$0 sm:$0xff]  ;;  %v1737_v21 = vld [vmem:[%s3238_s3 + $0xb8] sm:$0xff] }
  0x13   : > { %329 = vst [vmem:[#allocation2 + $0x70] sm:$0xff] %v2524_v4  ;;  %330 = vst [vmem:[#allocation2 + $0x78] sm:$0x3] %v2524_v4  ;;  %2128 = vmatprep.subr.mxu1 %v364_v8  ;;  %2085 = vmatpush3.msra.mxu0 %v1742_v7  ;;  %v2659_v17 = vld [vmem:[%s3237_s2] ss:$0 sm:$0xff]  ;;  %v284_v20 = vmul.f32 %v2654_v16, %v269_v15  ;;  %v359_v22 = vld [vmem:[%s3238_s3 + $0x38] sm:$0xff] }
  0x14   : > { %331 = vst [vmem:[#allocation2 + $0x80] sm:$0xff] %v2524_v4  ;;  %332 = vst [vmem:[#allocation2 + $0x88] sm:$0x3] %v2524_v4  ;;  %2129 = vmatpush3.msra.mxu1 %v364_v8  ;;  %2086 = vmatprep.subr.mxu0 %v1741_v9  ;;  %v1738_v18 = vld [vmem:[%s3238_s3 + $0xc0] sm:$0xff]  ;;  %v1736_v24 = vld [vmem:[%s3238_s3 + $0xb0] sm:$0xff] }
  0x15   : > { %333 = vst [vmem:[#allocation2 + $0x90] sm:$0xff] %v2524_v4  ;;  %334 = vst [vmem:[#allocation2 + $0x98] sm:$0x3] %v2524_v4  ;;  %2130 = vmatprep.subr.mxu1 %v363_v10  ;;  %2087 = vmatpush3.msra.mxu0 %v1741_v9  ;;  %v360_v19 = vld [vmem:[%s3238_s3 + $0x40] sm:$0xff]  ;;  %v299_v23 = vadd.f32 %v2659_v17, %v284_v20  ;;  %v358_v25 = vld [vmem:[%s3238_s3 + $0x30] sm:$0xff] }
  0x16   : > { %2131 = vmatpush3.msra.mxu1 %v363_v10  ;;  %2088 = vmatprep.subr.mxu0 %v1740_v11  ;;  %v1735_v27 = vld [vmem:[%s3238_s3 + $0xa8] sm:$0xff]  ;;  %v271_v31 = vld [vmem:[%s2642_s29 + $0x10] sm:$0xff]  ;;  %v1734_v32 = vld [vmem:[%s3238_s3 + $0xa0] sm:$0xff] }
  0x17   : > { %2132 = vmatprep.subr.mxu1 %v362_v12  ;;  %2089 = vmatpush3.msra.mxu0 %v1740_v11  ;;  %v2681_v26 = vmax.f32 %v299_v23, 0.0  ;;  %v357_v28 = vld [vmem:[%s3238_s3 + $0x28] sm:$0xff]  ;;  %v356_v33 = vld [vmem:[%s3238_s3 + $0x20] sm:$0xff]  ;;  %v286_v34 = vmul.f32 %v2654_v16, %v271_v31  ;;  %v272_v35 = vld [vmem:[%s2642_s29 + $0x18] sm:$0xff] }
  0x18   : > { %2133 = vmatpush3.msra.mxu1 %v362_v12  ;;  %2090 = vmatprep.subr.mxu0 %v1739_v13  ;;  %v270_v29 = vld [vmem:[%s2642_s29 + $0x8] sm:$0xff]  ;;  %v287_v37 = vmul.f32 %v2654_v16, %v272_v35  ;;  %v273_v38 = vld [vmem:[%s2642_s29 + $0x20] sm:$0xff]  ;;  %v1733_v39 = vld [vmem:[%s3238_s3 + $0x98] sm:$0xff] }
  0x19   : > { %2134 = vmatprep.subr.mxu1 %v361_v14  ;;  %2091 = vmatpush3.msra.mxu0 %v1739_v13  ;;  %336 = vst [vmem:[#allocation2 + $0x11] sm:$0xff] %v2681_v26  ;;  %v285_v30 = vmul.f32 %v2654_v16, %v270_v29  ;;  %v355_v40 = vld [vmem:[%s3238_s3 + $0x18] sm:$0xff]  ;;  %v301_v41 = vadd.f32 %v2659_v17, %v286_v34  ;;  %v274_v43 = vld [vmem:[%s2642_s29 + $0x28] sm:$0xff]  ;;  %v275_v47 = vld [vmem:[%s2642_s29 + $0x30] sm:$0xff] }
  0x1a   : > { %2135 = vmatpush3.msra.mxu1 %v361_v14  ;;  %2092 = vmatprep.subr.mxu0 %v1738_v18  ;;  %v288_v42 = vmul.f32 %v2654_v16, %v273_v38  ;;  %v302_v45 = vadd.f32 %v2659_v17, %v287_v37  ;;  %v289_v46 = vmul.f32 %v2654_v16, %v274_v43  ;;  %v1732_v48 = vld [vmem:[%s3238_s3 + $0x90] sm:$0xff]  ;;  %v1731_v55 = vld [vmem:[%s3238_s3 + $0x88] sm:$0xff]  ;;  %v1730_v60 = vld [vmem:[%s3238_s3 + $0x80] sm:$0xff] }
  0x1b   : > { %2136 = vmatprep.subr.mxu1 %v360_v19  ;;  %2093 = vmatpush3.msra.mxu0 %v1738_v18  ;;  %v300_v36 = vadd.f32 %v2659_v17, %v285_v30  ;;  %v354_v49 = vld [vmem:[%s3238_s3 + $0x10] sm:$0xff]  ;;  %v2724_v50 = vmax.f32 %v301_v41, 0.0  ;;  %v290_v52 = vmul.f32 %v2654_v16, %v275_v47  ;;  %v353_v56 = vld [vmem:[%s3238_s3 + $0x8] sm:$0xff]  ;;  %v352_v61 = vld [vmem:[%s3238_s3] sm:$0xff] }
  0x1c   : > { %2137 = vmatpush3.msra.mxu1 %v360_v19  ;;  %2094 = vmatprep.subr.mxu0 %v1737_v21  ;;  %v303_v51 = vadd.f32 %v2659_v17, %v288_v42  ;;  %v2729_v53 = vmax.f32 %v302_v45, 0.0  ;;  %v304_v54 = vadd.f32 %v2659_v17, %v289_v46  ;;  %v368_v63 = vld [vmem:[#allocation2 + $0x1] sm:$0xff]  ;;  %v276_v0 = vld [vmem:[%s2642_s29 + $0x38] sm:$0xff]  ;;  %v1760_v7 = vld [vmem:[%s3238_s3 + $0x170] sm:$0xff] }
  0x1d   : > { %2138 = vmatprep.subr.mxu1 %v359_v22  ;;  %2095 = vmatpush3.msra.mxu0 %v1737_v21  ;;  %v2713_v44 = vmax.f32 %v300_v36, 0.0  ;;  %338 = vst [vmem:[#allocation2 + $0x31] sm:$0xff] %v2724_v50  ;;  %v305_v58 = vadd.f32 %v2659_v17, %v290_v52  ;;  %v291_v2 = vmul.f32 %v2654_v16, %v276_v0  ;;  %v1761_v3 = vld [vmem:[%s3238_s3 + $0x178] sm:$0xff]  ;;  %v1776_v8 = vld [vmem:[%s3238_s3 + $0x1f0] sm:$0xff]  ;;  %v1759_v4 = vld [vmem:[%s3238_s3 + $0x168] sm:$0xff] }
  0x1e   : > { %2139 = vmatpush3.msra.mxu1 %v359_v22  ;;  %2096 = vmatprep.subr.mxu0 %v1736_v24  ;;  %v2739_v57 = vmax.f32 %v303_v51, 0.0  ;;  %339 = vst [vmem:[#allocation2 + $0x41] sm:$0xff] %v2729_v53  ;;  %v2743_v59 = vmax.f32 %v304_v54, 0.0  ;;  %v1777_v5 = vld [vmem:[%s3238_s3 + $0x1f8] sm:$0xff]  ;;  %v1775_v10 = vld [vmem:[%s3238_s3 + $0x1e8] sm:$0xff]  ;;  %v1758_v11 = vld [vmem:[%s3238_s3 + $0x160] sm:$0xff] }
  0x1f   : > { %2140 = vmatprep.subr.mxu1 %v358_v25  ;;  %2097 = vmatpush3.msra.mxu0 %v1736_v24  ;;  %337 = vst [vmem:[#allocation2 + $0x21] sm:$0xff] %v2713_v44  ;;  %v2752_v62 = vmax.f32 %v305_v58, 0.0  ;;  %v306_v6 = vadd.f32 %v2659_v17, %v291_v2  ;;  %v1774_v12 = vld [vmem:[%s3238_s3 + $0x1e0] sm:$0xff]  ;;  %v1757_v13 = vld [vmem:[%s3238_s3 + $0x158] sm:$0xff]  ;;  %v1756_v15 = vld [vmem:[%s3238_s3 + $0x150] sm:$0xff] }
  0x20   : > { %2141 = vmatpush3.msra.mxu1 %v358_v25  ;;  %2098 = vmatprep.subr.mxu0 %v1735_v27  ;;  %340 = vst [vmem:[#allocation2 + $0x51] sm:$0xff] %v2739_v57  ;;  %341 = vst [vmem:[#allocation2 + $0x61] sm:$0xff] %v2743_v59  ;;  %v2757_v1 = vld [vmem:[#allocation2 + $0x10] sm:$0xff]  ;;  %v1773_v14 = vld [vmem:[%s3238_s3 + $0x1d8] sm:$0xff] }
  0x21   : > { %2142 = vmatprep.subr.mxu1 %v357_v28  ;;  %2099 = vmatpush3.msra.mxu0 %v1735_v27  ;;  %342 = vst [vmem:[#allocation2 + $0x71] sm:$0xff] %v2752_v62  ;;  %v2776_v9 = vmax.f32 %v306_v6, 0.0  ;;  %v1772_v16 = vld [vmem:[%s3238_s3 + $0x1d0] sm:$0xff]  ;;  %v1755_v17 = vld [vmem:[%s3238_s3 + $0x148] sm:$0xff]  ;;  %v1754_v19 = vld [vmem:[%s3238_s3 + $0x140] sm:$0xff] }
  0x22   : > { %2143 = vmatpush3.msra.mxu1 %v357_v28  ;;  %2100 = vmatprep.subr.mxu0 %v1734_v32  ;;  %v1771_v18 = vld [vmem:[%s3238_s3 + $0x1c8] sm:$0xff]  ;;  %v1770_v20 = vld [vmem:[%s3238_s3 + $0x1c0] sm:$0xff]  ;;  %v1753_v21 = vld [vmem:[%s3238_s3 + $0x138] sm:$0xff] }
  0x23   : > { %2144 = vmatprep.subr.mxu1 %v356_v33  ;;  %2101 = vmatpush3.msra.mxu0 %v1734_v32  ;;  %343 = vst [vmem:[#allocation2 + $0x81] sm:$0xff] %v2776_v9  ;;  %v1769_v22 = vld [vmem:[%s3238_s3 + $0x1b8] sm:$0xff]  ;;  %v1752_v24 = vld [vmem:[%s3238_s3 + $0x130] sm:$0xff]  ;;  %v1751_v28 = vld [vmem:[%s3238_s3 + $0x128] sm:$0xff] }
  0x24   : > { %2145 = vmatpush3.msra.mxu1 %v356_v33  ;;  %2102 = vmatprep.subr.mxu0 %v1733_v39  ;;  %v1768_v25 = vld [vmem:[%s3238_s3 + $0x1b0] sm:$0xff]  ;;  %v1767_v29 = vld [vmem:[%s3238_s3 + $0x1a8] sm:$0xff]  ;;  %v1750_v31 = vld [vmem:[%s3238_s3 + $0x120] sm:$0xff] }
  0x25   : > { %2146 = vmatprep.subr.mxu1 %v355_v40  ;;  %2103 = vmatpush3.msra.mxu0 %v1733_v39  ;;  %v2829_v27 = vld [vmem:[#allocation2 + $0x30] sm:$0xff]  ;;  %v2841_v30 = vld [vmem:[#allocation2 + $0x40] sm:$0xff]  ;;  %v1749_v34 = vld [vmem:[%s3238_s3 + $0x118] sm:$0xff] }
  0x26   : > { %2147 = vmatpush3.msra.mxu1 %v355_v40  ;;  %2104 = vmatprep.subr.mxu0 %v1732_v48  ;;  %v2821_v23 = vld [vmem:[#allocation2 + $0x20] sm:$0xff]  ;;  %v1765_v35 = vld [vmem:[%s3238_s3 + $0x198] sm:$0xff]  ;;  %v1748_v37 = vld [vmem:[%s3238_s3 + $0x110] sm:$0xff] }
  0x27   : > { %2148 = vmatprep.subr.mxu1 %v354_v49  ;;  %2105 = vmatpush3.msra.mxu0 %v1732_v48  ;;  %v1766_v32 = vld [vmem:[%s3238_s3 + $0x1a0] sm:$0xff]  ;;  %v2849_v33 = vld [vmem:[#allocation2 + $0x50] sm:$0xff]  ;;  %v1747_v40 = vld [vmem:[%s3238_s3 + $0x108] sm:$0xff] }
  0x28   : > { %2149 = vmatpush3.msra.mxu1 %v354_v49  ;;  %2106 = vmatprep.subr.mxu0 %v1731_v55  ;;  %v2861_v36 = vld [vmem:[#allocation2 + $0x60] sm:$0xff]  ;;  %v1764_v38 = vld [vmem:[%s3238_s3 + $0x190] sm:$0xff]  ;;  %v1763_v41 = vld [vmem:[%s3238_s3 + $0x188] sm:$0xff] }
  0x29   : > { %2150 = vmatprep.subr.mxu1 %v353_v56  ;;  %2107 = vmatpush3.msra.mxu0 %v1731_v55  ;;  %v2869_v39 = vld [vmem:[#allocation2 + $0x70] sm:$0xff]  ;;  %v1746_v42 = vld [vmem:[%s3238_s3 + $0x100] sm:$0xff]  ;;  %v1793_v47 = vld [vmem:[%s3238_s3 + $0x278] sm:$0xff] }
  0x2a   : > { %2151 = vmatpush3.msra.mxu1 %v353_v56  ;;  %2108 = vmatprep.subr.mxu0 %v1730_v60  ;;  %v1762_v43 = vld [vmem:[%s3238_s3 + $0x180] sm:$0xff]  ;;  %v2887_v46 = vld [vmem:[#allocation2 + $0x12] sm:$0xff]  ;;  %v1791_v55 = vld [vmem:[%s3238_s3 + $0x268] sm:$0xff] }
  0x2b   : > { %2152 = vmatprep.subr.mxu1 %v352_v61  ;;  %2109 = vmatpush3.msra.mxu0 %v1730_v60  ;;  %v603_v45 = vld [vmem:[#allocation2 + $0x2] sm:$0xff]  ;;  %v1809_v48 = vld [vmem:[%s3238_s3 + $0x2f8] sm:$0xff]  ;;  %v1792_v49 = vld [vmem:[%s3238_s3 + $0x270] sm:$0xff] }
  0x2c   : > { %2110 = vmatprep.mubr.f32.mxu0 %v368_v63  ;;  %2153 = vmatpush3.msra.mxu1 %v352_v61  ;;  %v1808_v51 = vld [vmem:[%s3238_s3 + $0x2f0] sm:$0xff]  ;;  %v2904_v52 = vld [vmem:[#allocation2 + $0x22] sm:$0xff]  ;;  %v1789_v0 = vld [vmem:[%s3238_s3 + $0x258] sm:$0xff] }
  0x2d   : > { %2111 = vmatmul.mubr.f32.vlgmr.msra.gmra.mxu0 %v2681_v26  ;;  %2155 = vmatmul.mubr.f32.vlgmr.msra.gmra.mxu1 %v2757_v1  ;;  %v2906_v54 = vld [vmem:[#allocation2 + $0x32] sm:$0xff]  ;;  %v1807_v56 = vld [vmem:[%s3238_s3 + $0x2e8] sm:$0xff]  ;;  %v1790_v58 = vld [vmem:[%s3238_s3 + $0x260] sm:$0xff] }
  0x2e   : > { %2166 = vmatprep.subr.mxu0 %v1761_v3  ;;  %2210 = vmatprep.subr.mxu1 %v1777_v5  ;;  %v1806_v60 = vld [vmem:[%s3238_s3 + $0x2e0] sm:$0xff]  ;;  %v2925_v63 = vld [vmem:[#allocation2 + $0x52] sm:$0xff] }
  0x2f   : > { %2167 = vmatpush3.msra.mxu0 %v1761_v3  ;;  %2211 = vmatpush3.msra.mxu1 %v1777_v5  ;;  %v2923_v61 = vld [vmem:[#allocation2 + $0x42] sm:$0xff]  ;;  %v1788_v2 = vld [vmem:[%s3238_s3 + $0x250] sm:$0xff] }
  0x30   : > { %2168 = vmatprep.subr.mxu0 %v1760_v7  ;;  %2212 = vmatprep.subr.mxu1 %v1776_v8  ;;  %v1804_v3 = vld [vmem:[%s3238_s3 + $0x2d0] sm:$0xff]  ;;  %v2943_v5 = vld [vmem:[#allocation2 + $0x62] sm:$0xff] }
  0x31   : > { %2169 = vmatpush3.msra.mxu0 %v1760_v7  ;;  %2213 = vmatpush3.msra.mxu1 %v1776_v8  ;;  %v2945_v6 = vld [vmem:[#allocation2 + $0x72] sm:$0xff]  ;;  %v1787_v7 = vld [vmem:[%s3238_s3 + $0x248] sm:$0xff] }
  0x32   : > { %2170 = vmatprep.subr.mxu0 %v1759_v4  ;;  %2214 = vmatprep.subr.mxu1 %v1775_v10  ;;  %v1803_v8 = vld [vmem:[%s3238_s3 + $0x2c8] sm:$0xff] }
  0x33   : > { %2171 = vmatpush3.msra.mxu0 %v1759_v4  ;;  %2215 = vmatpush3.msra.mxu1 %v1775_v10  ;;  %v1786_v4 = vld [vmem:[%s3238_s3 + $0x240] sm:$0xff] }
  0x34   : > { %2172 = vmatprep.subr.mxu0 %v1758_v11  ;;  %2216 = vmatprep.subr.mxu1 %v1774_v12  ;;  %v2959_v10 = vld [vmem:[#allocation2 + $0x80] sm:$0xff] }
  0x35   : > { %2173 = vmatpush3.msra.mxu0 %v1758_v11  ;;  %2217 = vmatpush3.msra.mxu1 %v1774_v12  ;;  %v1802_v11 = vld [vmem:[%s3238_s3 + $0x2c0] sm:$0xff]  ;;  %v1785_v12 = vld [vmem:[%s3238_s3 + $0x238] sm:$0xff] }
  0x36   : > { %2174 = vmatprep.subr.mxu0 %v1757_v13  ;;  %2218 = vmatprep.subr.mxu1 %v1773_v14 }
  0x37   : > { %2175 = vmatpush3.msra.mxu0 %v1757_v13  ;;  %2219 = vmatpush3.msra.mxu1 %v1773_v14  ;;  %v1801_v13 = vld [vmem:[%s3238_s3 + $0x2b8] sm:$0xff]  ;;  %v1784_v14 = vld [vmem:[%s3238_s3 + $0x230] sm:$0xff] }
  0x38   : > { %2176 = vmatprep.subr.mxu0 %v1756_v15  ;;  %2220 = vmatprep.subr.mxu1 %v1772_v16 }
  0x39   : > { %2177 = vmatpush3.msra.mxu0 %v1756_v15  ;;  %2221 = vmatpush3.msra.mxu1 %v1772_v16  ;;  %v1800_v15 = vld [vmem:[%s3238_s3 + $0x2b0] sm:$0xff]  ;;  %v1783_v16 = vld [vmem:[%s3238_s3 + $0x228] sm:$0xff] }
  0x3a   : > { %2178 = vmatprep.subr.mxu0 %v1755_v17  ;;  %2222 = vmatprep.subr.mxu1 %v1771_v18 }
  0x3b   : > { %2179 = vmatpush3.msra.mxu0 %v1755_v17  ;;  %2223 = vmatpush3.msra.mxu1 %v1771_v18  ;;  %v1799_v17 = vld [vmem:[%s3238_s3 + $0x2a8] sm:$0xff]  ;;  %v1782_v18 = vld [vmem:[%s3238_s3 + $0x220] sm:$0xff] }
  0x3c   : > { %2180 = vmatprep.subr.mxu0 %v1754_v19  ;;  %2224 = vmatprep.subr.mxu1 %v1770_v20 }
  0x3d   : > { %2181 = vmatpush3.msra.mxu0 %v1754_v19  ;;  %2225 = vmatpush3.msra.mxu1 %v1770_v20  ;;  %v1798_v19 = vld [vmem:[%s3238_s3 + $0x2a0] sm:$0xff]  ;;  %v1781_v20 = vld [vmem:[%s3238_s3 + $0x218] sm:$0xff] }
  0x3e   : > { %2182 = vmatprep.subr.mxu0 %v1753_v21  ;;  %2226 = vmatprep.subr.mxu1 %v1769_v22 }
  0x3f   : > { %2183 = vmatpush3.msra.mxu0 %v1753_v21  ;;  %2227 = vmatpush3.msra.mxu1 %v1769_v22  ;;  %v1797_v21 = vld [vmem:[%s3238_s3 + $0x298] sm:$0xff]  ;;  %v1780_v22 = vld [vmem:[%s3238_s3 + $0x210] sm:$0xff] }
  0x40   : > { %2113 = vmatprep.mubr.f32.mxu0 %v2713_v44  ;;  %2157 = vmatprep.mubr.f32.mxu1 %v2821_v23 }
  0x41   : > { %2184 = vmatprep.subr.mxu0 %v1752_v24  ;;  %2228 = vmatprep.subr.mxu1 %v1768_v25 }
  0x42   : > { %2114 = vmatmul.mubr.f32.gmra.mxu0 %v2724_v50  ;;  %2158 = vmatmul.mubr.f32.gmra.mxu1 %v2829_v27 }
  0x43   : > { %2185 = vmatpush3.msra.mxu0 %v1752_v24  ;;  %2229 = vmatpush3.msra.mxu1 %v1768_v25  ;;  %v1796_v24 = vld [vmem:[%s3238_s3 + $0x290] sm:$0xff]  ;;  %v1779_v25 = vld [vmem:[%s3238_s3 + $0x208] sm:$0xff] }
  0x44   : > { %2186 = vmatprep.subr.mxu0 %v1751_v28  ;;  %2230 = vmatprep.subr.mxu1 %v1767_v29 }
  0x45   : > { %2187 = vmatpush3.msra.mxu0 %v1751_v28  ;;  %2231 = vmatpush3.msra.mxu1 %v1767_v29  ;;  %v1795_v28 = vld [vmem:[%s3238_s3 + $0x288] sm:$0xff]  ;;  %v1778_v29 = vld [vmem:[%s3238_s3 + $0x200] sm:$0xff] }
  0x46   : > { %2116 = vmatprep.mubr.f32.mxu0 %v2729_v53  ;;  %2160 = vmatprep.mubr.f32.mxu1 %v2841_v30 }
  0x47   : > { %2188 = vmatprep.subr.mxu0 %v1750_v31  ;;  %2232 = vmatprep.subr.mxu1 %v1766_v32 }
  0x48   : > { %2117 = vmatmul.mubr.f32.gmra.mxu0 %v2739_v57  ;;  %2161 = vmatmul.mubr.f32.gmra.mxu1 %v2849_v33 }
  0x49   : > { %2189 = vmatpush3.msra.mxu0 %v1750_v31  ;;  %2233 = vmatpush3.msra.mxu1 %v1766_v32  ;;  %v1794_v31 = vld [vmem:[%s3238_s3 + $0x280] sm:$0xff]  ;;  %v1825_v32 = vld [vmem:[%s3238_s3 + $0x378] sm:$0xff] }
  0x4a   : > { %2190 = vmatprep.subr.mxu0 %v1749_v34  ;;  %2234 = vmatprep.subr.mxu1 %v1765_v35 }
  0x4b   : > { %2191 = vmatpush3.msra.mxu0 %v1749_v34  ;;  %2235 = vmatpush3.msra.mxu1 %v1765_v35  ;;  %v1841_v34 = vld [vmem:[%s3238_s3 + $0x3f8] sm:$0xff]  ;;  %v1824_v35 = vld [vmem:[%s3238_s3 + $0x370] sm:$0xff] }
  0x4c   : > { %2119 = vmatprep.mubr.f32.mxu0 %v2743_v59  ;;  %2163 = vmatprep.mubr.f32.mxu1 %v2861_v36 }
  0x4d   : > { %2192 = vmatprep.subr.mxu0 %v1748_v37  ;;  %2236 = vmatprep.subr.mxu1 %v1764_v38 }
  0x4e   : > { %2120 = vmatmul.mubr.f32.gmra.mxu0 %v2752_v62  ;;  %2164 = vmatmul.mubr.f32.gmra.mxu1 %v2869_v39 }
  0x4f   : > { %2193 = vmatpush3.msra.mxu0 %v1748_v37  ;;  %2237 = vmatpush3.msra.mxu1 %v1764_v38  ;;  %v1840_v37 = vld [vmem:[%s3238_s3 + $0x3f0] sm:$0xff]  ;;  %v1839_v38 = vld [vmem:[%s3238_s3 + $0x3e8] sm:$0xff] }
  0x50   : > { %2194 = vmatprep.subr.mxu0 %v1747_v40  ;;  %2238 = vmatprep.subr.mxu1 %v1763_v41 }
  0x51   : > { %2195 = vmatpush3.msra.mxu0 %v1747_v40  ;;  %2239 = vmatpush3.msra.mxu1 %v1763_v41  ;;  %v1822_v40 = vld [vmem:[%s3238_s3 + $0x360] sm:$0xff] }
  0x52   : > { %2196 = vmatprep.subr.mxu0 %v1746_v42  ;;  %2240 = vmatprep.subr.mxu1 %v1762_v43  ;;  %v1838_v41 = vld [vmem:[%s3238_s3 + $0x3e0] sm:$0xff] }
  0x53   : > { %2197 = vmatpush3.msra.mxu0 %v1746_v42  ;;  %2198 = vmatprep.mubr.f32.mxu0 %v603_v45  ;;  %v1821_v42 = vld [vmem:[%s3238_s3 + $0x358] sm:$0xff]  ;;  %v1820_v45 = vld [vmem:[%s3238_s3 + $0x350] sm:$0xff] }
  0x54   : > { %2241 = vmatpush3.msra.mxu1 %v1762_v43  ;;  %2199 = vmatmul.mubr.f32.vlgmr.msra.gmra.mxu0 %v2887_v46  ;;  %v1837_v43 = vld [vmem:[%s3238_s3 + $0x3d8] sm:$0xff] }
  0x55   : > { %2242 = vmatprep.mubr.f32.mxu1 %v2757_v1  ;;  %2254 = vmatprep.subr.mxu0 %v1793_v47  ;;  %v1805_v1 = vld [vmem:[%s3238_s3 + $0x2d8] sm:$0xff] }
  0x56   : > { %2298 = vmatprep.subr.mxu1 %v1809_v48  ;;  %2243 = vmatmul.mubr.f32.vlgmr.msra.gmra.mxu1 %v2821_v23 }
  0x57   : > { %2255 = vmatpush3.msra.mxu0 %v1793_v47  ;;  %2299 = vmatpush3.msra.mxu1 %v1809_v48  ;;  %v1819_v47 = vld [vmem:[%s3238_s3 + $0x348] sm:$0xff] }
  0x58   : > { %2256 = vmatprep.subr.mxu0 %v1792_v49  ;;  %2300 = vmatprep.subr.mxu1 %v1808_v51  ;;  %v1835_v48 = vld [vmem:[%s3238_s3 + $0x3c8] sm:$0xff] }
  0x59   : > { %2201 = vmatprep.mubr.f32.mxu0 %v2904_v52  ;;  %2257 = vmatpush3.msra.mxu0 %v1792_v49  ;;  %v1818_v49 = vld [vmem:[%s3238_s3 + $0x340] sm:$0xff] }
  0x5a   : > { %2301 = vmatpush3.msra.mxu1 %v1808_v51  ;;  %2202 = vmatmul.mubr.f32.gmra.mxu0 %v2906_v54  ;;  %v3073_v51 = vld [vmem:[#allocation2 + $0x82] sm:$0xff] }
  0x5b   : > { %2258 = vmatprep.subr.mxu0 %v1791_v55  ;;  %2302 = vmatprep.subr.mxu1 %v1807_v56 }
  0x5c   : > { %2245 = vmatprep.mubr.f32.mxu1 %v2829_v27  ;;  %2259 = vmatpush3.msra.mxu0 %v1791_v55  ;;  %v1834_v55 = vld [vmem:[%s3238_s3 + $0x3c0] sm:$0xff] }
  0x5d   : > { %2303 = vmatpush3.msra.mxu1 %v1807_v56  ;;  %2260 = vmatprep.subr.mxu0 %v1790_v58  ;;  %v1817_v56 = vld [vmem:[%s3238_s3 + $0x338] sm:$0xff] }
  0x5e   : > { %2246 = vmatmul.mubr.f32.gmra.mxu1 %v2841_v30  ;;  %2304 = vmatprep.subr.mxu1 %v1806_v60 }
  0x5f   : > { %2204 = vmatprep.mubr.f32.mxu0 %v2923_v61  ;;  %2261 = vmatpush3.msra.mxu0 %v1790_v58  ;;  %v1833_v58 = vld [vmem:[%s3238_s3 + $0x3b8] sm:$0xff] }
  0x60   : > { %2305 = vmatpush3.msra.mxu1 %v1806_v60  ;;  %2205 = vmatmul.mubr.f32.gmra.mxu0 %v2925_v63  ;;  %v1816_v60 = vld [vmem:[%s3238_s3 + $0x330] sm:$0xff] }
  0x61   : > { %2262 = vmatprep.subr.mxu0 %v1789_v0  ;;  %2306 = vmatprep.subr.mxu1 %v1805_v1 }
  0x62   : > { %2248 = vmatprep.mubr.f32.mxu1 %v2849_v33  ;;  %2263 = vmatpush3.msra.mxu0 %v1789_v0  ;;  %v1832_v0 = vld [vmem:[%s3238_s3 + $0x3b0] sm:$0xff] }
  0x63   : > { %2307 = vmatpush3.msra.mxu1 %v1805_v1  ;;  %2264 = vmatprep.subr.mxu0 %v1788_v2  ;;  %v1815_v1 = vld [vmem:[%s3238_s3 + $0x328] sm:$0xff] }
  0x64   : > { %2249 = vmatmul.mubr.f32.gmra.mxu1 %v2861_v36  ;;  %2308 = vmatprep.subr.mxu1 %v1804_v3 }
  0x65   : > { %2207 = vmatprep.mubr.f32.mxu0 %v2943_v5  ;;  %2265 = vmatpush3.msra.mxu0 %v1788_v2  ;;  %v1831_v2 = vld [vmem:[%s3238_s3 + $0x3a8] sm:$0xff] }
  0x66   : > { %2309 = vmatpush3.msra.mxu1 %v1804_v3  ;;  %2208 = vmatmul.mubr.f32.gmra.mxu0 %v2945_v6  ;;  %v1814_v3 = vld [vmem:[%s3238_s3 + $0x320] sm:$0xff] }
  0x67   : > { %2266 = vmatprep.subr.mxu0 %v1787_v7  ;;  %2310 = vmatprep.subr.mxu1 %v1803_v8 }
  0x68   : > { %2251 = vmatprep.mubr.f32.mxu1 %v2869_v39  ;;  %2267 = vmatpush3.msra.mxu0 %v1787_v7  ;;  %v1830_v7 = vld [vmem:[%s3238_s3 + $0x3a0] sm:$0xff] }
  0x69   : > { %2311 = vmatpush3.msra.mxu1 %v1803_v8  ;;  %2268 = vmatprep.subr.mxu0 %v1786_v4  ;;  %v1813_v8 = vld [vmem:[%s3238_s3 + $0x318] sm:$0xff] }
  0x6a   : > { %2252 = vmatmul.mubr.f32.gmra.mxu1 %v2959_v10  ;;  %2312 = vmatprep.subr.mxu1 %v1802_v11 }
  0x6b   : > { %2269 = vmatpush3.msra.mxu0 %v1786_v4  ;;  %2313 = vmatpush3.msra.mxu1 %v1802_v11  ;;  %v1829_v4 = vld [vmem:[%s3238_s3 + $0x398] sm:$0xff]  ;;  %v1812_v11 = vld [vmem:[%s3238_s3 + $0x310] sm:$0xff] }
  0x6c   : > { %2270 = vmatprep.subr.mxu0 %v1785_v12  ;;  %2314 = vmatprep.subr.mxu1 %v1801_v13 }
  0x6d   : > { %2271 = vmatpush3.msra.mxu0 %v1785_v12  ;;  %2315 = vmatpush3.msra.mxu1 %v1801_v13  ;;  %v1828_v12 = vld [vmem:[%s3238_s3 + $0x390] sm:$0xff]  ;;  %v1811_v13 = vld [vmem:[%s3238_s3 + $0x308] sm:$0xff] }
  0x6e   : > { %2272 = vmatprep.subr.mxu0 %v1784_v14  ;;  %2316 = vmatprep.subr.mxu1 %v1800_v15 }
  0x6f   : > { %2273 = vmatpush3.msra.mxu0 %v1784_v14  ;;  %2317 = vmatpush3.msra.mxu1 %v1800_v15  ;;  %v1827_v14 = vld [vmem:[%s3238_s3 + $0x388] sm:$0xff]  ;;  %v1810_v15 = vld [vmem:[%s3238_s3 + $0x300] sm:$0xff] }
  0x70   : > { %2274 = vmatprep.subr.mxu0 %v1783_v16  ;;  %2318 = vmatprep.subr.mxu1 %v1799_v17 }
  0x71   : > { %2275 = vmatpush3.msra.mxu0 %v1783_v16  ;;  %2319 = vmatpush3.msra.mxu1 %v1799_v17  ;;  %v1826_v16 = vld [vmem:[%s3238_s3 + $0x380] sm:$0xff]  ;;  %v1857_v17 = vld [vmem:[%s3238_s3 + $0x478] sm:$0xff] }
  0x72   : > { %2276 = vmatprep.subr.mxu0 %v1782_v18  ;;  %2320 = vmatprep.subr.mxu1 %v1798_v19 }
  0x73   : > { %2277 = vmatpush3.msra.mxu0 %v1782_v18  ;;  %2321 = vmatpush3.msra.mxu1 %v1798_v19  ;;  %v1856_v18 = vld [vmem:[%s3238_s3 + $0x470] sm:$0xff]  ;;  %v1843_v19 = vld [vmem:[%s3238_s3 + $0x408] sm:$0xff] }
  0x74   : > { %2278 = vmatprep.subr.mxu0 %v1781_v20  ;;  %2322 = vmatprep.subr.mxu1 %v1797_v21 }
  0x75   : > { %2279 = vmatpush3.msra.mxu0 %v1781_v20  ;;  %2323 = vmatpush3.msra.mxu1 %v1797_v21  ;;  %v1842_v20 = vld [vmem:[%s3238_s3 + $0x400] sm:$0xff]  ;;  %v1439_v21 = vld [vmem:[#allocation2 + $0x92] sm:$0xff] }
  0x76   : > { %2280 = vmatprep.subr.mxu0 %v1780_v22  ;;  %2324 = vmatprep.subr.mxu1 %v1796_v24 }
  0x77   : > { %2281 = vmatpush3.msra.mxu0 %v1780_v22  ;;  %2325 = vmatpush3.msra.mxu1 %v1796_v24 }
  0x78   : > { %2282 = vmatprep.subr.mxu0 %v1779_v25  ;;  %2326 = vmatprep.subr.mxu1 %v1795_v28 }
  0x79   : > { %2283 = vmatpush3.msra.mxu0 %v1779_v25  ;;  %2327 = vmatpush3.msra.mxu1 %v1795_v28 }
  0x7a   : > { %2284 = vmatprep.subr.mxu0 %v1778_v29  ;;  %2328 = vmatprep.subr.mxu1 %v1794_v31 }
  0x7b   : > { %2285 = vmatpush3.msra.mxu0 %v1778_v29  ;;  %2286 = vmatprep.mubr.f32.mxu0 %v2681_v26  ;;  %v1823_v26 = vld [vmem:[%s3238_s3 + $0x368] sm:$0xff] }
  0x7c   : > { %2329 = vmatpush3.msra.mxu1 %v1794_v31  ;;  %2287 = vmatmul.mubr.f32.vlgmr.msra.gmra.mxu0 %v2713_v44 }
  0x7d   : > { %2330 = vmatprep.mubr.f32.mxu1 %v2887_v46  ;;  %2342 = vmatprep.subr.mxu0 %v1825_v32  ;;  %v1836_v46 = vld [vmem:[%s3238_s3 + $0x3d0] sm:$0xff] }
  0x7e   : > { %2386 = vmatprep.subr.mxu1 %v1841_v34  ;;  %2331 = vmatmul.mubr.f32.vlgmr.msra.gmra.mxu1 %v2904_v52 }
  0x7f   : > { %2343 = vmatpush3.msra.mxu0 %v1825_v32  ;;  %2387 = vmatpush3.msra.mxu1 %v1841_v34 }
  0x80   : > { %2344 = vmatprep.subr.mxu0 %v1824_v35  ;;  %2388 = vmatprep.subr.mxu1 %v1840_v37 }
  0x81   : > { %2289 = vmatprep.mubr.f32.mxu0 %v2724_v50  ;;  %2345 = vmatpush3.msra.mxu0 %v1824_v35 }
  0x82   : > { %2389 = vmatpush3.msra.mxu1 %v1840_v37  ;;  %2290 = vmatmul.mubr.f32.gmra.mxu0 %v2729_v53 }
  0x83   : > { %2346 = vmatprep.subr.mxu0 %v1823_v26  ;;  %2390 = vmatprep.subr.mxu1 %v1839_v38 }
  0x84   : > { %2333 = vmatprep.mubr.f32.mxu1 %v2906_v54  ;;  %2347 = vmatpush3.msra.mxu0 %v1823_v26 }
  0x85   : > { %2391 = vmatpush3.msra.mxu1 %v1839_v38  ;;  %2348 = vmatprep.subr.mxu0 %v1822_v40 }
  0x86   : > { %2334 = vmatmul.mubr.f32.gmra.mxu1 %v2923_v61  ;;  %2392 = vmatprep.subr.mxu1 %v1838_v41 }
  0x87   : > { %2292 = vmatprep.mubr.f32.mxu0 %v2739_v57  ;;  %2349 = vmatpush3.msra.mxu0 %v1822_v40 }
  0x88   : > { %2393 = vmatpush3.msra.mxu1 %v1838_v41  ;;  %2293 = vmatmul.mubr.f32.gmra.mxu0 %v2743_v59 }
  0x89   : > { %2350 = vmatprep.subr.mxu0 %v1821_v42  ;;  %2394 = vmatprep.subr.mxu1 %v1837_v43 }
  0x8a   : > { %2336 = vmatprep.mubr.f32.mxu1 %v2925_v63  ;;  %2351 = vmatpush3.msra.mxu0 %v1821_v42 }
  0x8b   : > { %2395 = vmatpush3.msra.mxu1 %v1837_v43  ;;  %2352 = vmatprep.subr.mxu0 %v1820_v45 }
  0x8c   : > { %2337 = vmatmul.mubr.f32.gmra.mxu1 %v2943_v5  ;;  %2396 = vmatprep.subr.mxu1 %v1836_v46 }
  0x8d   : > { %2295 = vmatprep.mubr.f32.mxu0 %v2752_v62  ;;  %2353 = vmatpush3.msra.mxu0 %v1820_v45 }
  0x8e   : > { %2397 = vmatpush3.msra.mxu1 %v1836_v46  ;;  %2296 = vmatmul.mubr.f32.gmra.mxu0 %v2776_v9 }
  0x8f   : > { %2354 = vmatprep.subr.mxu0 %v1819_v47  ;;  %2398 = vmatprep.subr.mxu1 %v1835_v48 }
  0x90   : > { %2339 = vmatprep.mubr.f32.mxu1 %v2945_v6  ;;  %2355 = vmatpush3.msra.mxu0 %v1819_v47 }
  0x91   : > { %2399 = vmatpush3.msra.mxu1 %v1835_v48  ;;  %2356 = vmatprep.subr.mxu0 %v1818_v49 }
  0x92   : > { %2340 = vmatmul.mubr.f32.gmra.mxu1 %v3073_v51  ;;  %2400 = vmatprep.subr.mxu1 %v1834_v55 }
  0x93   : > { %2357 = vmatpush3.msra.mxu0 %v1818_v49  ;;  %2401 = vmatpush3.msra.mxu1 %v1834_v55 }
  0x94   : > { %2358 = vmatprep.subr.mxu0 %v1817_v56  ;;  %2402 = vmatprep.subr.mxu1 %v1833_v58 }
  0x95   : > { %2359 = vmatpush3.msra.mxu0 %v1817_v56  ;;  %2403 = vmatpush3.msra.mxu1 %v1833_v58 }
  0x96   : > { %2360 = vmatprep.subr.mxu0 %v1816_v60  ;;  %2404 = vmatprep.subr.mxu1 %v1832_v0 }
  0x97   : > { %2361 = vmatpush3.msra.mxu0 %v1816_v60  ;;  %2405 = vmatpush3.msra.mxu1 %v1832_v0 }
  0x98   : > { %2362 = vmatprep.subr.mxu0 %v1815_v1  ;;  %2406 = vmatprep.subr.mxu1 %v1831_v2 }
  0x99   : > { %2363 = vmatpush3.msra.mxu0 %v1815_v1  ;;  %2407 = vmatpush3.msra.mxu1 %v1831_v2 }
  0x9a   : > { %2364 = vmatprep.subr.mxu0 %v1814_v3  ;;  %2408 = vmatprep.subr.mxu1 %v1830_v7 }
  0x9b   : > { %2365 = vmatpush3.msra.mxu0 %v1814_v3  ;;  %2409 = vmatpush3.msra.mxu1 %v1830_v7 }
  0x9c   : > { %2366 = vmatprep.subr.mxu0 %v1813_v8  ;;  %2410 = vmatprep.subr.mxu1 %v1829_v4 }
  0x9d   : > { %2367 = vmatpush3.msra.mxu0 %v1813_v8  ;;  %2411 = vmatpush3.msra.mxu1 %v1829_v4 }
  0x9e   : > { %2368 = vmatprep.subr.mxu0 %v1812_v11  ;;  %2412 = vmatprep.subr.mxu1 %v1828_v12 }
  0x9f   : > { %2369 = vmatpush3.msra.mxu0 %v1812_v11  ;;  %2413 = vmatpush3.msra.mxu1 %v1828_v12 }
  0xa0   : > { %2370 = vmatprep.subr.mxu0 %v1811_v13  ;;  %2414 = vmatprep.subr.mxu1 %v1827_v14 }
  0xa1   : > { %2371 = vmatpush3.msra.mxu0 %v1811_v13  ;;  %2415 = vmatpush3.msra.mxu1 %v1827_v14 }
  0xa2   : > { %2372 = vmatprep.subr.mxu0 %v1810_v15  ;;  %2416 = vmatprep.subr.mxu1 %v1826_v16 }
  0xa3   : > { %2373 = vmatpush3.msra.mxu0 %v1810_v15  ;;  %2374 = vmatprep.mubr.f32.mxu0 %v2821_v23  ;;  %v1855_v23 = vld [vmem:[%s3238_s3 + $0x468] sm:$0xff] }
  0xa4   : > { %2417 = vmatpush3.msra.mxu1 %v1826_v16  ;;  %2375 = vmatmul.mubr.f32.vlgmr.msra.gmra.mxu0 %v2829_v27  ;;  %v2515_v27 = vld [vmem:[#allocation2] sm:$0xff] }
  0xa5   : > { %2418 = vmatprep.mubr.f32.mxu1 %v2713_v44  ;;  %2430 = vmatprep.subr.mxu0 %v1857_v17  ;;  %v1854_v44 = vld [vmem:[%s3238_s3 + $0x460] sm:$0xff] }
  0xa6   : > { %2474 = vmatprep.subr.mxu1 %v1857_v17  ;;  %2419 = vmatmul.mubr.f32.vlgmr.msra.gmra.mxu1 %v2724_v50  ;;  %v1853_v50 = vld [vmem:[%s3238_s3 + $0x458] sm:$0xff] }
  0xa7   : > { %2431 = vmatpush3.msra.mxu0 %v1857_v17  ;;  %2490 = vmatpush3.msra.mxu1 %v1857_v17 }
  0xa8   : > { %2432 = vmatprep.subr.mxu0 %v1856_v18  ;;  %2475 = vmatprep.subr.mxu1 %v1856_v18 }
  0xa9   : > { %2377 = vmatprep.mubr.f32.mxu0 %v2841_v30  ;;  %2433 = vmatpush3.msra.mxu0 %v1856_v18  ;;  %v1301_v30 = vld [vmem:[#allocation2 + $0x91] sm:$0xff] }
  0xaa   : > { %2491 = vmatpush3.msra.mxu1 %v1856_v18  ;;  %2378 = vmatmul.mubr.f32.gmra.mxu0 %v2849_v33  ;;  %v1848_v33 = vld [vmem:[%s3238_s3 + $0x430] sm:$0xff] }
  0xab   : > { %2434 = vmatprep.subr.mxu0 %v1855_v23  ;;  %2476 = vmatprep.subr.mxu1 %v1855_v23 }
  0xac   : > { %2421 = vmatprep.mubr.f32.mxu1 %v2729_v53  ;;  %2435 = vmatpush3.msra.mxu0 %v1855_v23  ;;  %v1852_v53 = vld [vmem:[%s3238_s3 + $0x450] sm:$0xff] }
  0xad   : > { %2492 = vmatpush3.msra.mxu1 %v1855_v23  ;;  %2436 = vmatprep.subr.mxu0 %v1854_v44 }
  0xae   : > { %2422 = vmatmul.mubr.f32.gmra.mxu1 %v2739_v57  ;;  %2477 = vmatprep.subr.mxu1 %v1854_v44  ;;  %v1851_v57 = vld [vmem:[%s3238_s3 + $0x448] sm:$0xff] }
  0xaf   : > { %2380 = vmatprep.mubr.f32.mxu0 %v2861_v36  ;;  %2437 = vmatpush3.msra.mxu0 %v1854_v44  ;;  %v1846_v36 = vld [vmem:[%s3238_s3 + $0x420] sm:$0xff] }
  0xb0   : > { %2493 = vmatpush3.msra.mxu1 %v1854_v44  ;;  %2381 = vmatmul.mubr.f32.gmra.mxu0 %v2869_v39  ;;  %v1845_v39 = vld [vmem:[%s3238_s3 + $0x418] sm:$0xff] }
  0xb1   : > { %2438 = vmatprep.subr.mxu0 %v1853_v50  ;;  %2478 = vmatprep.subr.mxu1 %v1853_v50 }
  0xb2   : > { %2424 = vmatprep.mubr.f32.mxu1 %v2743_v59  ;;  %2439 = vmatpush3.msra.mxu0 %v1853_v50  ;;  %v1850_v59 = vld [vmem:[%s3238_s3 + $0x440] sm:$0xff] }
  0xb3   : > { %2494 = vmatpush3.msra.mxu1 %v1853_v50  ;;  %2440 = vmatprep.subr.mxu0 %v1852_v53 }
  0xb4   : > { %2425 = vmatmul.mubr.f32.gmra.mxu1 %v2752_v62  ;;  %2479 = vmatprep.subr.mxu1 %v1852_v53  ;;  %v1849_v62 = vld [vmem:[%s3238_s3 + $0x438] sm:$0xff] }
  0xb5   : > { %2383 = vmatprep.mubr.f32.mxu0 %v2959_v10  ;;  %2441 = vmatpush3.msra.mxu0 %v1852_v53  ;;  %v1844_v10 = vld [vmem:[%s3238_s3 + $0x410] sm:$0xff] }
  0xb6   : > { %2495 = vmatpush3.msra.mxu1 %v1852_v53  ;;  %2384 = vmatmul.mubr.f32.gmra.mxu0 %v2515_v27 }
  0xb7   : > { %2442 = vmatprep.subr.mxu0 %v1851_v57  ;;  %2480 = vmatprep.subr.mxu1 %v1851_v57 }
  0xb8   : > { %2427 = vmatprep.mubr.f32.mxu1 %v2776_v9  ;;  %2443 = vmatpush3.msra.mxu0 %v1851_v57  ;;  %v1847_v9 = vld [vmem:[%s3238_s3 + $0x428] sm:$0xff] }
  0xb9   : > { %2496 = vmatpush3.msra.mxu1 %v1851_v57  ;;  %2444 = vmatprep.subr.mxu0 %v1850_v59 }
  0xba   : > { %2428 = vmatmul.mubr.f32.gmra.mxu1 %v1301_v30  ;;  %2481 = vmatprep.subr.mxu1 %v1850_v59 }
  0xbb   : > { %2445 = vmatpush3.msra.mxu0 %v1850_v59  ;;  %2497 = vmatpush3.msra.mxu1 %v1850_v59 }
  0xbc   : > { %2446 = vmatprep.subr.mxu0 %v1849_v62  ;;  %2482 = vmatprep.subr.mxu1 %v1849_v62 }
  0xbd   : > { %2447 = vmatpush3.msra.mxu0 %v1849_v62  ;;  %2498 = vmatpush3.msra.mxu1 %v1849_v62 }
  0xbe   : > { %2448 = vmatprep.subr.mxu0 %v1848_v33  ;;  %2483 = vmatprep.subr.mxu1 %v1848_v33 }
  0xbf   : > { %2449 = vmatpush3.msra.mxu0 %v1848_v33  ;;  %2499 = vmatpush3.msra.mxu1 %v1848_v33 }
  0xc0   : > { %2450 = vmatprep.subr.mxu0 %v1847_v9  ;;  %2484 = vmatprep.subr.mxu1 %v1847_v9 }
  0xc1   : > { %2451 = vmatpush3.msra.mxu0 %v1847_v9  ;;  %2500 = vmatpush3.msra.mxu1 %v1847_v9 }
  0xc2   : > { %2452 = vmatprep.subr.mxu0 %v1846_v36  ;;  %2485 = vmatprep.subr.mxu1 %v1846_v36 }
  0xc3   : > { %2453 = vmatpush3.msra.mxu0 %v1846_v36  ;;  %2501 = vmatpush3.msra.mxu1 %v1846_v36 }
  0xc4   : > { %2454 = vmatprep.subr.mxu0 %v1845_v39  ;;  %2486 = vmatprep.subr.mxu1 %v1845_v39 }
  0xc5   : > { %2455 = vmatpush3.msra.mxu0 %v1845_v39  ;;  %2502 = vmatpush3.msra.mxu1 %v1845_v39 }
  0xc6   : > { %2456 = vmatprep.subr.mxu0 %v1844_v10  ;;  %2487 = vmatprep.subr.mxu1 %v1844_v10 }
  0xc7   : > { %2457 = vmatpush3.msra.mxu0 %v1844_v10  ;;  %2503 = vmatpush3.msra.mxu1 %v1844_v10 }
  0xc8   : > { %2458 = vmatprep.subr.mxu0 %v1843_v19  ;;  %2488 = vmatprep.subr.mxu1 %v1843_v19 }
  0xc9   : > { %2459 = vmatpush3.msra.mxu0 %v1843_v19  ;;  %2504 = vmatpush3.msra.mxu1 %v1843_v19 }
  0xca   : > { %2460 = vmatprep.subr.mxu0 %v1842_v20  ;;  %2489 = vmatprep.subr.mxu1 %v1842_v20 }
  0xcb   : > { %2461 = vmatpush3.msra.mxu0 %v1842_v20  ;;  %2505 = vmatpush3.msra.mxu1 %v1842_v20 }
  0xcc   : > { %2462 = vmatprep.mubr.f32.mxu0 %v2904_v52  ;;  %2468 = vmatprep.mubr.f32.mxu1 %v2943_v5 }
  0xcd   : > { %2463 = vmatmul.mubr.f32.vlgmr.msra.gmra.mxu0 %v2906_v54  ;;  %2469 = vmatmul.mubr.f32.vlgmr.msra.gmra.mxu1 %v2945_v6 }
  0xce   : > { %2465 = vmatprep.mubr.f32.mxu0 %v2923_v61  ;;  %2471 = vmatprep.mubr.f32.mxu1 %v3073_v51 }
  0xd1   : > { %2466 = vmatmul.mubr.f32.gmra.mxu0 %v2925_v63  ;;  %2472 = vmatmul.mubr.f32.gmra.mxu1 %v1439_v21 }
  0xed   : > { %v2112_v22 = vpop.f32.mrf.mxu0  ;;  %v2156_v24 = vpop.f32.mrf.mxu1 }
  0xee   : > { %v570_v30 = vadd.f32 %v2156_v24, %v2112_v22 }
  0xef   : > { %v459_v25 = vpop.f32.mrf.mxu0  ;;  %v564_v28 = vpop.f32.mrf.mxu1 }
  0xf0   : > { %v565_v33 = vadd.f32 %v564_v28, %v459_v25 }
 0x102   : > { %v2115_v29 = vpop.f32.mrf.mxu0  ;;  %v2159_v52 = vpop.f32.mrf.mxu1 }
 0x103   : > { %v580_v21 = vadd.f32 %v2159_v52, %v2115_v29 }
 0x104   : > { %v469_v31 = vpop.f32.mrf.mxu0  ;;  %v574_v5 = vpop.f32.mrf.mxu1 }
 0x108   : > { %v2118_v32 = vpop.f32.mrf.mxu0  ;;  %v2162_v54 = vpop.f32.mrf.mxu1 }
 0x109   : > { %v590_v62 = vadd.f32 %v2162_v54, %v2118_v32 }
 0x10a   : > { %v479_v34 = vpop.f32.mrf.mxu0  ;;  %v584_v6 = vpop.f32.mrf.mxu1 }
 0x10b   : > { %v585_v39 = vadd.f32 %v584_v6, %v479_v34 }
 0x10e   : > { %v2121_v35 = vpop.f32.mrf.mxu0  ;;  %v2165_v61 = vpop.f32.mrf.mxu1 }
 0x110   : > { %v489_v37 = vpop.f32.mrf.mxu0  ;;  %v594_v26 = vpop.f32.mrf.mxu1 }
 0x111   : > { %v595_v32 = vadd.f32 %v594_v26, %v489_v37 }
 0x114   : > { %v2200_v38 = vpop.f32.mrf.mxu0 }
 0x115   : > { %v734_v10 = vadd.f32 %v2200_v38, %v570_v30 }
 0x116   : > { %v2244_v40 = vpop.f32.mrf.mxu1  ;;  %v694_v63 = vpop.f32.mrf.mxu0 }
 0x117   : > { %v733_v20 = vadd.f32 %v694_v63, %v565_v33  ;;  %v872_v54 = vadd.f32 %v2244_v40, %v734_v10 }
 0x118   : > { %v832_v41 = vpop.f32.mrf.mxu1 }
 0x11a   : > { %v2203_v42 = vpop.f32.mrf.mxu0 }
 0x11b   : > { %v736_v25 = vadd.f32 %v2203_v42, %v580_v21 }
 0x11c   : > { %v704_v45 = vpop.f32.mrf.mxu0 }
 0x11e   : > { %v2247_v43 = vpop.f32.mrf.mxu1 }
 0x11f   : > { %v874_v52 = vadd.f32 %v2247_v43, %v736_v25 }
 0x120   : > { %v842_v46 = vpop.f32.mrf.mxu1  ;;  %v2206_v47 = vpop.f32.mrf.mxu0 }
 0x121   : > { %v738_v19 = vadd.f32 %v2206_v47, %v590_v62 }
 0x122   : > { %v714_v49 = vpop.f32.mrf.mxu0 }
 0x124   : > { %v2250_v48 = vpop.f32.mrf.mxu1 }
 0x125   : > { %v876_v28 = vadd.f32 %v2250_v48, %v738_v19 }
 0x126   : > { %v852_v51 = vpop.f32.mrf.mxu1  ;;  %v2209_v55 = vpop.f32.mrf.mxu0 }
 0x128   : > { %v724_v58 = vpop.f32.mrf.mxu0 }
 0x129   : > { %v739_v38 = vadd.f32 %v724_v58, %v595_v32 }
 0x12a   : > { %v2253_v56 = vpop.f32.mrf.mxu1 }
 0x12c   : > { %v862_v60 = vpop.f32.mrf.mxu1 }
 0x13c   : > { %v2288_v0 = vpop.f32.mrf.mxu0 }
 0x13d   : > { %v1010_v47 = vadd.f32 %v2288_v0, %v872_v54 }
 0x13e   : > { %v2332_v1 = vpop.f32.mrf.mxu1  ;;  %v970_v2 = vpop.f32.mrf.mxu0 }
 0x140   : > { %v1108_v3 = vpop.f32.mrf.mxu1 }
 0x142   : > { %v2291_v7 = vpop.f32.mrf.mxu0 }
 0x143   : > { %v1012_v37 = vadd.f32 %v2291_v7, %v874_v52 }
 0x144   : > { %v980_v4 = vpop.f32.mrf.mxu0 }
 0x146   : > { %v3197_v8 = vpop.f32.mrf.mxu1 }
 0x147   : > { %3243 = vst [vmem:[#allocation3_spill] sm:$0xff] %v3197_v8  ;;  %v575_v8 = vadd.f32 %v574_v5, %v469_v31 }
 0x148   : > { %v3199_v11 = vpop.f32.mrf.mxu1  ;;  %v2294_v12 = vpop.f32.mrf.mxu0 }
 0x149   : > { %3244 = vst [vmem:[#allocation4_spill] sm:$0xff] %v3199_v11  ;;  %v737_v11 = vadd.f32 %v714_v49, %v585_v39  ;;  %v735_v6 = vadd.f32 %v704_v45, %v575_v8  ;;  %v1014_v62 = vadd.f32 %v2294_v12, %v876_v28 }
 0x14a   : > { %v990_v14 = vpop.f32.mrf.mxu0 }
 0x14b   : > { %v875_v30 = vadd.f32 %v852_v51, %v737_v11  ;;  %v873_v31 = vadd.f32 %v842_v46, %v735_v6 }
 0x14c   : > { %v2338_v13 = vpop.f32.mrf.mxu1 }
 0x14d   : > { %v1013_v49 = vadd.f32 %v990_v14, %v875_v30  ;;  %v1152_v26 = vadd.f32 %v2338_v13, %v1014_v62  ;;  %v1011_v42 = vadd.f32 %v980_v4, %v873_v31 }
 0x14e   : > { %v1128_v15 = vpop.f32.mrf.mxu1  ;;  %v2297_v16 = vpop.f32.mrf.mxu0  ;;  %v3247_v8 = vld [vmem:[#allocation3_spill] sm:$0xff] }
 0x14f   : > { %v1151_v51 = vadd.f32 %v1128_v15, %v1013_v49  ;;  %v1150_v43 = vadd.f32 %v3247_v8, %v1012_v37 }
 0x150   : > { %v1000_v18 = vpop.f32.mrf.mxu0  ;;  %v3248_v46 = vld [vmem:[#allocation4_spill] sm:$0xff] }
 0x152   : > { %v2341_v17 = vpop.f32.mrf.mxu1 }
 0x154   : > { %v1138_v23 = vpop.f32.mrf.mxu1 }
 0x164   : > { %v2376_v44 = vpop.f32.mrf.mxu0 }
 0x166   : > { %v2420_v50 = vpop.f32.mrf.mxu1  ;;  %v1247_v53 = vpop.f32.mrf.mxu0 }
 0x168   : > { %v1385_v57 = vpop.f32.mrf.mxu1 }
 0x16a   : > { %v2379_v27 = vpop.f32.mrf.mxu0 }
 0x16b   : > { %v1289_v4 = vadd.f32 %v2379_v27, %v1150_v43 }
 0x16c   : > { %v1257_v9 = vpop.f32.mrf.mxu0 }
 0x16e   : > { %v3201_v59 = vpop.f32.mrf.mxu1 }
 0x16f   : > { %3245 = vst [vmem:[#allocation5_spill] sm:$0xff] %v3201_v59  ;;  %v600_v59 = vadd.f32 %v2165_v61, %v2121_v35  ;;  %v877_v35 = vadd.f32 %v862_v60, %v739_v38  ;;  %v1148_v61 = vadd.f32 %v2332_v1, %v1010_v47 }
 0x170   : > { %v3203_v36 = vpop.f32.mrf.mxu1  ;;  %v2382_v22 = vpop.f32.mrf.mxu0 }
 0x171   : > { %3246 = vst [vmem:[#allocation6_spill] sm:$0xff] %v3203_v36  ;;  %v871_v36 = vadd.f32 %v832_v41, %v733_v20  ;;  %v740_v34 = vadd.f32 %v2209_v55, %v600_v59  ;;  %v1015_v55 = vadd.f32 %v1000_v18, %v877_v35  ;;  %v1287_v58 = vadd.f32 %v2376_v44, %v1148_v61 }
 0x172   : > { %v1267_v63 = vpop.f32.mrf.mxu0  ;;  %v1291_v0 = vadd.f32 %v2382_v22, %v1152_v26 }
 0x173   : > { %v1009_v33 = vadd.f32 %v970_v2, %v871_v36  ;;  %v878_v5 = vadd.f32 %v2253_v56, %v740_v34  ;;  %v1290_v11 = vadd.f32 %v1267_v63, %v1151_v51  ;;  %v1149_v56 = vadd.f32 %v3248_v46, %v1011_v42 }
 0x174   : > { %v2426_v24 = vpop.f32.mrf.mxu1  ;;  %v1153_v12 = vadd.f32 %v1138_v23, %v1015_v55 }
 0x175   : > { %v1147_v40 = vadd.f32 %v1108_v3, %v1009_v33  ;;  %v1016_v41 = vadd.f32 %v2297_v16, %v878_v5  ;;  %v1425_v3 = vadd.f32 %v2420_v50, %v1287_v58  ;;  %v1429_v13 = vadd.f32 %v2426_v24, %v1291_v0 }
 0x176   : > { %v1405_v29 = vpop.f32.mrf.mxu1  ;;  %v2385_v45 = vpop.f32.mrf.mxu0  ;;  %v1288_v16 = vadd.f32 %v1257_v9, %v1149_v56  ;;  %v3249_v59 = vld [vmem:[#allocation5_spill] sm:$0xff] }
 0x177   : > { %v1286_v2 = vadd.f32 %v1247_v53, %v1147_v40  ;;  %v1154_v60 = vadd.f32 %v2341_v17, %v1016_v41  ;;  %v1428_v17 = vadd.f32 %v1405_v29, %v1290_v11  ;;  %v1427_v9 = vadd.f32 %v3249_v59, %v1289_v4 }
 0x178   : > { %v1277_v1 = vpop.f32.mrf.mxu0  ;;  %v3250_v21 = vld [vmem:[#allocation6_spill] sm:$0xff] }
 0x179   : > { %v1424_v14 = vadd.f32 %v1385_v57, %v1286_v2  ;;  %v1293_v15 = vadd.f32 %v2385_v45, %v1154_v60  ;;  %v1292_v53 = vadd.f32 %v1277_v1, %v1153_v12  ;;  %v1426_v22 = vadd.f32 %v3250_v21, %v1288_v16 }
 0x17a   : > { %v2429_v48 = vpop.f32.mrf.mxu1 }
 0x17b   : > { %v1431_v10 = vadd.f32 %v2429_v48, %v1293_v15 }
 0x17c   : > { %v1415_v7 = vpop.f32.mrf.mxu1 }
 0x17d   : > { %v1430_v24 = vadd.f32 %v1415_v7, %v1292_v53 }
 0x18d   : > { %v2464_v18 = vpop.f32.mrf.mxu0  ;;  %v2470_v44 = vpop.f32.mrf.mxu1 }
 0x18e   : > { %v1563_v23 = vadd.f32 %v2464_v18, %v1425_v3  ;;  %v1567_v50 = vadd.f32 %v2470_v44, %v1429_v13 }
 0x18f   : > { %v1523_v27 = vpop.f32.mrf.mxu0  ;;  %v1543_v57 = vpop.f32.mrf.mxu1 }
 0x190   : > { %1571 = vst [vmem:[%s3212_s28 + $0x8] sm:$0xff] %v1563_v23  ;;  %1575 = vst [vmem:[%s3212_s28 + $0x28] sm:$0xff] %v1567_v50  ;;  %v1562_v36 = vadd.f32 %v1523_v27, %v1424_v14  ;;  %v1566_v39 = vadd.f32 %v1543_v57, %v1428_v17  ;;  %v1593_v34 = vmul.f32 %v1563_v23, %v1563_v23 }
 0x191   : > { %v2467_v19 = vpop.f32.mrf.mxu0  ;;  %v2473_v20 = vpop.f32.mrf.mxu1  ;;  %v1597_v61 = vmul.f32 %v1567_v50, %v1567_v50 }
 0x192   : > { %1570 = vst [vmem:[%s3212_s28] sm:$0xff] %v1562_v36  ;;  %v1592_v32 = vmul.f32 %v1562_v36, %v1562_v36  ;;  %1574 = vst [vmem:[%s3212_s28 + $0x20] sm:$0xff] %v1566_v39  ;;  %v1565_v54 = vadd.f32 %v2467_v19, %v1427_v9  ;;  %v1569_v25 = vadd.f32 %v2473_v20, %v1431_v10 }
 0x193   : > { %v1533_v28 = vpop.f32.mrf.mxu0  ;;  %v1553_v6 = vpop.f32.mrf.mxu1  ;;  %v1578_v30 = vadd.f32 %v1563_v23, %v1562_v36  ;;  %v1596_v31 = vmul.f32 %v1566_v39, %v1566_v39 }
 0x194   : > { %1573 = vst [vmem:[%s3212_s28 + $0x18] sm:$0xff] %v1565_v54  ;;  %v1564_v38 = vadd.f32 %v1533_v28, %v1426_v22  ;;  %v1568_v47 = vadd.f32 %v1553_v6, %v1430_v24  ;;  %1577 = vst [vmem:[%s3212_s28 + $0x38] sm:$0xff] %v1569_v25  ;;  %v1600_v62 = vadd.f32 %v1593_v34, %v1592_v32 }
 0x195   : > { %v1595_v29 = vmul.f32 %v1565_v54, %v1565_v54  ;;  %v1599_v45 = vmul.f32 %v1569_v25, %v1569_v25 }
 0x196   : > { %1572 = vst [vmem:[%s3212_s28 + $0x10] sm:$0xff] %v1564_v38  ;;  %v1579_v33 = vadd.f32 %v1578_v30, %v1564_v38  ;;  %v1594_v63 = vmul.f32 %v1564_v38, %v1564_v38  ;;  %1576 = vst [vmem:[%s3212_s28 + $0x30] sm:$0xff] %v1568_v47  ;;  %v1598_v42 = vmul.f32 %v1568_v47, %v1568_v47 }
 0x198   : > { %v1580_v52 = vadd.f32 %v1579_v33, %v1565_v54  ;;  %v1601_v49 = vadd.f32 %v1600_v62, %v1594_v63 }
 0x19a   : > { %v1602_v5 = vadd.f32 %v1601_v49, %v1595_v29  ;;  %v1581_v35 = vadd.f32 %v1580_v52, %v1566_v39 }
 0x19c   : > { %v1582_v37 = vadd.f32 %v1581_v35, %v1567_v50  ;;  %v1603_v26 = vadd.f32 %v1602_v5, %v1596_v31 }
 0x19e   : > { %v1583_v40 = vadd.f32 %v1582_v37, %v1568_v47  ;;  %v1604_v41 = vadd.f32 %v1603_v26, %v1597_v61 }
 0x1a0   : > { %v1584_v48 = vadd.f32 %v1583_v40, %v1569_v25  ;;  %v1605_v51 = vadd.f32 %v1604_v41, %v1598_v42 }
 0x1a2   : > { %v1585_v55 = vrot.slane %v1584_v48, 4  ;;  %v1606_v58 = vadd.f32 %v1605_v51, %v1599_v45 }
 0x1a4   : > { %v1586_v0 = vadd.f32 %v1585_v55, %v1584_v48  ;;  %v1607_v2 = vrot.slane %v1606_v58, 4 }
 0x1a6   : > { %v1587_v8 = vrot.slane %v1586_v0, 2  ;;  %v1608_v43 = vadd.f32 %v1607_v2, %v1606_v58 }
 0x1a8   : > { %v1588_v11 = vadd.f32 %v1587_v8, %v1586_v0  ;;  %v1609_v46 = vrot.slane %v1608_v43, 2 }
 0x1aa   : > { %v1589_v56 = vrot.slane %v1588_v11, 1  ;;  %v1610_v60 = vadd.f32 %v1609_v46, %v1608_v43 }
 0x1ac   : > { %v1590_v1 = vadd.f32 %v1589_v56, %v1588_v11  ;;  %v1611_v7 = vrot.slane %v1610_v60, 1 }
 0x1ae   : > { %1591 = vst [vmem:[%s265_s7] sm:$0x1] %v1590_v1  ;;  %v1612_v12 = vadd.f32 %v1611_v7, %v1610_v60 }
 0x1b0   : > { %1613 = vst [vmem:[%s268_s10] sm:$0x1] %v1612_v12 }
 0x1b1 PF: > { %s17_s21 = sadd.s32 1, %s2522_s21  }
 0x1b2   : > { %p14_p4 = scmp.ge.s32.totalorder %s17_s21, 4  }
 0x1b4   :  { %16 = sbr.rel (!%p14_p4) target bundleno = 1 (0x1), region = 100 }

</bundles_post_ra>
